<compile_context>
chip_gen: v5e
topology: v5e:2x2
jax: 0.10.0
libtpu: 0.0.40
codegen_flags: <defaults>
</compile_context>

<pallas_src>
import functools

import jax
import jax.numpy as jnp
from jax.experimental import pallas as pl
from jax.experimental.pallas import tpu as pltpu

INPUT_SIZE = 512  # fixed by the module: nn.GRU(512, nh, num_layers=2)


def _round_up(x, m):
    return (x + m - 1) // m * m


# ---------------------------------------------------------------------------
# Kernel
# ---------------------------------------------------------------------------
def _make_encoder_kernel(W, BP, nh, GP):
    """W: seq length, BP: padded batch (multiple of 8), nh: hidden, GP: padded 3*nh."""

    def kernel(x_ref,                       # (W*BP, 512)   pooled inputs
               wih0_ref, b0_ref,            # (512, GP), (1, GP)  layer-0 input path
               whh0_ref, bhh0n_ref,         # (nh, GP),  (1, nh)  layer-0 hidden path
               wih1_ref, b1_ref,            # (nh, GP),  (1, GP)  layer-1 input path
               whh1_ref, bhh1n_ref,         # (nh, GP),  (1, nh)  layer-1 hidden path
               out_ref,                     # (2, BP, nh)
               gx_sc):                      # VMEM scratch (W*BP, GP)
        # ---- Prologue: layer-0 input projection for ALL timesteps, one MXU call.
        gx_sc[...] = (
            jnp.dot(x_ref[...], wih0_ref[...], preferred_element_type=jnp.float32)
            + jnp.broadcast_to(b0_ref[...], (W * BP, GP)))

        # ---- Hoist loop invariants (weights + broadcast biases) out of the loop.
        whh0 = whh0_ref[...]
        wih1 = wih1_ref[...]
        whh1 = whh1_ref[...]
        b1c = jnp.broadcast_to(b1_ref[...], (BP, GP))
        bhh0n = jnp.broadcast_to(bhh0n_ref[...], (BP, nh))
        bhh1n = jnp.broadcast_to(bhh1n_ref[...], (BP, nh))

        def gru_gates(gx, gh, h, bhn):
            # gx already contains b_ih (+ b_hh for r/z); gates packed [r | z | n | pad].
            r = jax.nn.sigmoid(gx[:, 0:nh] + gh[:, 0:nh])
            z = jax.nn.sigmoid(gx[:, nh:2 * nh] + gh[:, nh:2 * nh])
            n = jnp.tanh(gx[:, 2 * nh:3 * nh] + r * (gh[:, 2 * nh:3 * nh] + bhn))
            return (1.0 - z) * n + z * h

        def step(t, carry):
            h0, h1 = carry
            start = pl.multiple_of(t * BP, BP)          # BP is a multiple of 8
            gx0 = gx_sc[pl.ds(start, BP), :]            # (BP, GP) precomputed x-path

            # layer 0: only the tiny hidden-to-hidden matmul is on the serial path
            gh0 = jnp.dot(h0, whh0, preferred_element_type=jnp.float32)
            h0_new = gru_gates(gx0, gh0, h0, bhh0n)

            # layer 1: input is layer 0's output at this timestep
            gx1 = jnp.dot(h0_new, wih1, preferred_element_type=jnp.float32) + b1c
            gh1 = jnp.dot(h1, whh1, preferred_element_type=jnp.float32)
            h1_new = gru_gates(gx1, gh1, h1, bhh1n)
            return (h0_new, h1_new)

        h_init = jnp.zeros((BP, nh), jnp.float32)
        h0, h1 = jax.lax.fori_loop(0, W, step, (h_init, h_init),
                                   unroll=min(W, 8))

        # ---- Single final store (final hidden state of each layer).
        out_ref[0] = h0.astype(out_ref.dtype)
        out_ref[1] = h1.astype(out_ref.dtype)

    return kernel


# ---------------------------------------------------------------------------
# Wrapper
# ---------------------------------------------------------------------------
def encoder_forward(feature, params):
    B, C, H, W = feature.shape
    assert C == INPUT_SIZE, "GRU input size is fixed to 512 by the module"
    assert H <= 6, "squeeze(2) in the reference module requires ceil(H/6) == 1"
    assert W >= 1
    nh = params["whh0"].shape[-1]

    f32 = jnp.float32
    GP = _round_up(3 * nh, 128)     # packed gate width, lane-dense
    BP = _round_up(B, 8)            # sublane-aligned batch

    # max_pool2d((6,1),(6,1),ceil_mode=True) + squeeze(2): one window -> max over H.
    pooled = jnp.max(feature.astype(f32), axis=2)        # (B, C, W)
    x = jnp.transpose(pooled, (2, 0, 1))                 # (W, B, C)
    if BP != B:
        x = jnp.pad(x, ((0, 0), (0, BP - B), (0, 0)))
    x2d = x.reshape(W * BP, C)                           # (W*BP, 512)

    # ---- pack weights: gate order r, z, n -> (in, 3*nh) zero-padded to GP lanes.
    def pack_w(w):
        w = jnp.asarray(w, f32)                          # (3, in, nh)
        wp = jnp.concatenate([w[0], w[1], w[2]], axis=-1)
        return jnp.pad(wp, ((0, 0), (0, GP - 3 * nh)))

    def as_bias(b):
        return jnp.asarray(b, f32).reshape(3, 1, nh)     # robust to (3,nh) or (3,1,nh)

    def pack_bias_combined(b_ih, b_hh):
        # r/z: b_ih + b_hh pre-summed; n: b_ih only (b_hh[n] applied inside r*(...)).
        b_ih, b_hh = as_bias(b_ih), as_bias(b_hh)
        bp = jnp.concatenate([b_ih[0] + b_hh[0],
                              b_ih[1] + b_hh[1],
                              b_ih[2]], axis=-1)         # (1, 3*nh)
        return jnp.pad(bp, ((0, 0), (0, GP - 3 * nh)))

    wih0p = pack_w(params["wih0"])                       # (512, GP)
    whh0p = pack_w(params["whh0"])                       # (nh,  GP)
    wih1p = pack_w(params["wih1"])                       # (nh,  GP)
    whh1p = pack_w(params["whh1"])                       # (nh,  GP)
    b0c = pack_bias_combined(params["bih0"], params["bhh0"])
    b1c = pack_bias_combined(params["bih1"], params["bhh1"])
    bhh0n = as_bias(params["bhh0"])[2]                   # (1, nh)
    bhh1n = as_bias(params["bhh1"])[2]                   # (1, nh)

    kernel = _make_encoder_kernel(W, BP, nh, GP)
    vmem = pl.BlockSpec(memory_space=pltpu.MemorySpace.VMEM)

    hidden = pl.pallas_call(
        kernel,
        out_shape=jax.ShapeDtypeStruct((2, BP, nh), f32),
        in_specs=[vmem] * 9,
        out_specs=vmem,
        scratch_shapes=[pltpu.VMEM((W * BP, GP), f32)],
    )(x2d, wih0p, b0c, whh0p, bhh0n, wih1p, b1c, whh1p, bhh1n)

    # (2, BP, nh) -> drop batch padding -> permute(1, 2, 0) -> (B, nh, 2)
    return jnp.transpose(hidden[:, :B, :], (1, 2, 0))


# ---------------------------------------------------------------------------
# Params + pure-JAX reference for validation
# ---------------------------------------------------------------------------
def init_params(key, nh):
    """Deterministic synthetic GRU weights (PyTorch-style U(-1/sqrt(nh), 1/sqrt(nh)))."""
    k = 1.0 / float(jnp.sqrt(jnp.float32(nh)))
    keys = jax.random.split(key, 8)

    def u(kk, shape):
        return jax.random.uniform(kk, shape, jnp.float32, -k, k)

    return {
        "wih0": u(keys[0], (3, INPUT_SIZE, nh)),
        "whh0": u(keys[1], (3, nh, nh)),
        "bih0": u(keys[2], (3, 1, nh)),
        "bhh0": u(keys[3], (3, 1, nh)),
        "wih1": u(keys[4], (3, nh, nh)),
        "whh1": u(keys[5], (3, nh, nh)),
        "bih1": u(keys[6], (3, 1, nh)),
        "bhh1": u(keys[7], (3, 1, nh)),
    }
    # NOTE: fc1/fc2/fc3 from __init__ are unused in forward, so not materialized.


def _gru_cell(x, h, w_ih, w_hh, b_ih, b_hh):
    """PyTorch-convention GRU cell. w_*: (3, in, nh), b_*: (3, 1, nh); gates r,z,n."""
    r = jax.nn.sigmoid(jnp.dot(x, w_ih[0]) + b_ih[0] + jnp.dot(h, w_hh[0]) + b_hh[0])
    z = jax.nn.sigmoid(jnp.dot(x, w_ih[1]) + b_ih[1] + jnp.dot(h, w_hh[1]) + b_hh[1])
    n = jnp.tanh(jnp.dot(x, w_ih[2]) + b_ih[2] + r * (jnp.dot(h, w_hh[2]) + b_hh[2]))
    return (1.0 - z) * n + z * h


def encoder_reference(feature, params):
    """Pure-JAX reference (lax.scan GRU) for correctness checking."""
    B, C, H, W = feature.shape
    nh = params["whh0"].shape[-1]
    pooled = jnp.max(feature.astype(jnp.float32), axis=2)   # (B, C, W)
    x = jnp.transpose(pooled, (2, 0, 1))                    # (W, B, C)

    def step(carry, x_t):
        h0, h1 = carry
        h0 = _gru_cell(x_t, h0, params["wih0"], params["whh0"],
                       params["bih0"], params["bhh0"])
        h1 = _gru_cell(h0, h1, params["wih1"], params["whh1"],
                       params["bih1"], params["bhh1"])
        return (h0, h1), None

    h0 = jnp.zeros((B, nh), jnp.float32)
    h1 = jnp.zeros((B, nh), jnp.float32)
    (h0, h1), _ = jax.lax.scan(step, (h0, h1), x)
    hidden = jnp.stack([h0, h1], axis=0)                    # (2, B, nh)
    return jnp.transpose(hidden, (1, 2, 0))                 # (B, nh, 2)


if __name__ == "__main__":
    key = jax.random.PRNGKey(0)
    k_feat, k_param = jax.random.split(key)

    B, C, H, W = 2, 512, 6, 8   # C must be 512 (GRU input size); W = sequence length
    nh = 32

    feature = jax.random.normal(k_feat, (B, C, H, W), jnp.float32)
    params = init_params(k_param, nh)

    out = jax.block_until_ready(encoder_forward(feature, params))
    ref = jax.block_until_ready(encoder_reference(feature, params))

    assert out.shape == (B, nh, 2), out.shape
    if not jnp.allclose(out, ref, atol=1e-4, rtol=1e-4):
        raise AssertionError("Pallas kernel output does not match JAX reference")

    print("KERNEL_OK")
</pallas_src>

<mosaic_0001>
module attributes {stable_mosaic.version = 11 : i64} {
  func.func @kernel(%arg0: memref<64x512xf32, #tpu.memory_space<vmem>>, %arg1: memref<512x128xf32, #tpu.memory_space<vmem>>, %arg2: memref<1x128xf32, #tpu.memory_space<vmem>>, %arg3: memref<32x128xf32, #tpu.memory_space<vmem>>, %arg4: memref<1x32xf32, #tpu.memory_space<vmem>>, %arg5: memref<32x128xf32, #tpu.memory_space<vmem>>, %arg6: memref<1x128xf32, #tpu.memory_space<vmem>>, %arg7: memref<32x128xf32, #tpu.memory_space<vmem>>, %arg8: memref<1x32xf32, #tpu.memory_space<vmem>>, %arg9: memref<2x8x32xf32, #tpu.memory_space<vmem>>, %arg10: memref<64x128xf32, #tpu.memory_space<vmem>>) attributes {dimension_semantics = [], scalar_prefetch = 0 : i64, scratch_operands = 1 : i64, tpu.core_type = #tpu.core_type<tc>} {
    %c0 = arith.constant 0 : index
    %c0_0 = arith.constant 0 : index
    %0 = vector.load %arg0[%c0, %c0_0] : memref<64x512xf32, #tpu.memory_space<vmem>>, vector<64x512xf32>
    %c0_1 = arith.constant 0 : index
    %c0_2 = arith.constant 0 : index
    %1 = vector.load %arg1[%c0_1, %c0_2] : memref<512x128xf32, #tpu.memory_space<vmem>>, vector<512x128xf32>
    %cst = arith.constant dense<0.000000e+00> : vector<64x128xf32>
    %2 = tpu.matmul %0, %1, %cst {dimension_numbers = #tpu.dot_dimension_numbers<[1], [0], [0], [1], [0, 0, 1, 1], [], []>} : vector<64x512xf32>, vector<512x128xf32>, vector<64x128xf32> -> vector<64x128xf32>
    %c0_3 = arith.constant 0 : index
    %c0_4 = arith.constant 0 : index
    %3 = vector.load %arg2[%c0_3, %c0_4] : memref<1x128xf32, #tpu.memory_space<vmem>>, vector<1x128xf32>
    %4 = vector.shape_cast %3 : vector<1x128xf32> to vector<1x128xf32>
    %5 = vector.broadcast %4 : vector<1x128xf32> to vector<64x128xf32>
    %6 = arith.addf %2, %5 : vector<64x128xf32>
    %c0_5 = arith.constant 0 : index
    %c0_6 = arith.constant 0 : index
    %7 = vector.load %arg10[%c0_5, %c0_6] : memref<64x128xf32, #tpu.memory_space<vmem>>, vector<64x128xf32>
    tpu.vector_store %arg10[%c0_5, %c0_6], %6 {strides = array<i32>} : memref<64x128xf32, #tpu.memory_space<vmem>>, vector<64x128xf32>,
    %c0_7 = arith.constant 0 : index
    %c0_8 = arith.constant 0 : index
    %8 = vector.load %arg3[%c0_7, %c0_8] : memref<32x128xf32, #tpu.memory_space<vmem>>, vector<32x128xf32>
    %c0_9 = arith.constant 0 : index
    %c0_10 = arith.constant 0 : index
    %9 = vector.load %arg5[%c0_9, %c0_10] : memref<32x128xf32, #tpu.memory_space<vmem>>, vector<32x128xf32>
    %c0_11 = arith.constant 0 : index
    %c0_12 = arith.constant 0 : index
    %10 = vector.load %arg7[%c0_11, %c0_12] : memref<32x128xf32, #tpu.memory_space<vmem>>, vector<32x128xf32>
    %c0_13 = arith.constant 0 : index
    %c0_14 = arith.constant 0 : index
    %11 = vector.load %arg6[%c0_13, %c0_14] : memref<1x128xf32, #tpu.memory_space<vmem>>, vector<1x128xf32>
    %12 = vector.shape_cast %11 : vector<1x128xf32> to vector<1x128xf32>
    %13 = vector.broadcast %12 : vector<1x128xf32> to vector<8x128xf32>
    %c0_15 = arith.constant 0 : index
    %c0_16 = arith.constant 0 : index
    %14 = vector.load %arg4[%c0_15, %c0_16] : memref<1x32xf32, #tpu.memory_space<vmem>>, vector<1x32xf32>
    %15 = vector.shape_cast %14 : vector<1x32xf32> to vector<1x32xf32>
    %16 = vector.broadcast %15 : vector<1x32xf32> to vector<8x32xf32>
    %c0_17 = arith.constant 0 : index
    %c0_18 = arith.constant 0 : index
    %17 = vector.load %arg8[%c0_17, %c0_18] : memref<1x32xf32, #tpu.memory_space<vmem>>, vector<1x32xf32>
    %18 = vector.shape_cast %17 : vector<1x32xf32> to vector<1x32xf32>
    %19 = vector.broadcast %18 : vector<1x32xf32> to vector<8x32xf32>
    %cst_19 = arith.constant 0.000000e+00 : f32
    %20 = vector.broadcast %cst_19 : f32 to vector<8x32xf32>
    %c0_i32 = arith.constant 0 : i32
    %c8_i32 = arith.constant 8 : i32
    %21 = arith.muli %c0_i32, %c8_i32 : i32
    %22 = tpu.assume_multiple %21, 8 : i32
    %23 = arith.index_cast %22 : i32 to index
    %c0_20 = arith.constant 0 : index
    %24 = vector.load %arg10[%23, %c0_20] : memref<64x128xf32, #tpu.memory_space<vmem>>, vector<8x128xf32>
    %cst_21 = arith.constant dense<0.000000e+00> : vector<8x128xf32>
    %25 = tpu.matmul %20, %8, %cst_21 {dimension_numbers = #tpu.dot_dimension_numbers<[1], [0], [0], [1], [0, 0, 1, 1], [], []>} : vector<8x32xf32>, vector<32x128xf32>, vector<8x128xf32> -> vector<8x128xf32>
    %26 = vector.extract_strided_slice %24 {offsets = [0, 0], sizes = [8, 32], strides = [1, 1]} : vector<8x128xf32> to vector<8x32xf32>
    %27 = vector.extract_strided_slice %25 {offsets = [0, 0], sizes = [8, 32], strides = [1, 1]} : vector<8x128xf32> to vector<8x32xf32>
    %28 = arith.addf %26, %27 : vector<8x32xf32>
    %29 = arith.negf %28 : vector<8x32xf32>
    %30 = math.exp %29 : vector<8x32xf32>
    %cst_22 = arith.constant 1.000000e+00 : f32
    %31 = vector.broadcast %cst_22 : f32 to vector<8x32xf32>
    %32 = arith.addf %31, %30 : vector<8x32xf32>
    %33 = arith.divf %31, %32 : vector<8x32xf32>
    %34 = vector.extract_strided_slice %24 {offsets = [0, 32], sizes = [8, 32], strides = [1, 1]} : vector<8x128xf32> to vector<8x32xf32>
    %35 = vector.extract_strided_slice %25 {offsets = [0, 32], sizes = [8, 32], strides = [1, 1]} : vector<8x128xf32> to vector<8x32xf32>
    %36 = arith.addf %34, %35 : vector<8x32xf32>
    %37 = arith.negf %36 : vector<8x32xf32>
    %38 = math.exp %37 : vector<8x32xf32>
    %cst_23 = arith.constant 1.000000e+00 : f32
    %39 = vector.broadcast %cst_23 : f32 to vector<8x32xf32>
    %40 = arith.addf %39, %38 : vector<8x32xf32>
    %41 = arith.divf %39, %40 : vector<8x32xf32>
    %42 = vector.extract_strided_slice %24 {offsets = [0, 64], sizes = [8, 32], strides = [1, 1]} : vector<8x128xf32> to vector<8x32xf32>
    %43 = vector.extract_strided_slice %25 {offsets = [0, 64], sizes = [8, 32], strides = [1, 1]} : vector<8x128xf32> to vector<8x32xf32>
    %44 = arith.addf %43, %16 : vector<8x32xf32>
    %45 = arith.mulf %33, %44 : vector<8x32xf32>
    %46 = arith.addf %42, %45 : vector<8x32xf32>
    %47 = math.tanh %46 : vector<8x32xf32>
    %cst_24 = arith.constant 1.000000e+00 : f32
    %48 = vector.broadcast %cst_24 : f32 to vector<8x32xf32>
    %49 = arith.subf %48, %41 : vector<8x32xf32>
    %50 = arith.mulf %49, %47 : vector<8x32xf32>
    %51 = arith.mulf %41, %20 : vector<8x32xf32>
    %52 = arith.addf %50, %51 : vector<8x32xf32>
    %cst_25 = arith.constant dense<0.000000e+00> : vector<8x128xf32>
    %53 = tpu.matmul %52, %9, %cst_25 {dimension_numbers = #tpu.dot_dimension_numbers<[1], [0], [0], [1], [0, 0, 1, 1], [], []>} : vector<8x32xf32>, vector<32x128xf32>, vector<8x128xf32> -> vector<8x128xf32>
    %54 = arith.addf %53, %13 : vector<8x128xf32>
    %cst_26 = arith.constant dense<0.000000e+00> : vector<8x128xf32>
    %55 = tpu.matmul %20, %10, %cst_26 {dimension_numbers = #tpu.dot_dimension_numbers<[1], [0], [0], [1], [0, 0, 1, 1], [], []>} : vector<8x32xf32>, vector<32x128xf32>, vector<8x128xf32> -> vector<8x128xf32>
    %56 = vector.extract_strided_slice %54 {offsets = [0, 0], sizes = [8, 32], strides = [1, 1]} : vector<8x128xf32> to vector<8x32xf32>
    %57 = vector.extract_strided_slice %55 {offsets = [0, 0], sizes = [8, 32], strides = [1, 1]} : vector<8x128xf32> to vector<8x32xf32>
    %58 = arith.addf %56, %57 : vector<8x32xf32>
    %59 = arith.negf %58 : vector<8x32xf32>
    %60 = math.exp %59 : vector<8x32xf32>
    %cst_27 = arith.constant 1.000000e+00 : f32
    %61 = vector.broadcast %cst_27 : f32 to vector<8x32xf32>
    %62 = arith.addf %61, %60 : vector<8x32xf32>
    %63 = arith.divf %61, %62 : vector<8x32xf32>
    %64 = vector.extract_strided_slice %54 {offsets = [0, 32], sizes = [8, 32], strides = [1, 1]} : vector<8x128xf32> to vector<8x32xf32>
    %65 = vector.extract_strided_slice %55 {offsets = [0, 32], sizes = [8, 32], strides = [1, 1]} : vector<8x128xf32> to vector<8x32xf32>
    %66 = arith.addf %64, %65 : vector<8x32xf32>
    %67 = arith.negf %66 : vector<8x32xf32>
    %68 = math.exp %67 : vector<8x32xf32>
    %cst_28 = arith.constant 1.000000e+00 : f32
    %69 = vector.broadcast %cst_28 : f32 to vector<8x32xf32>
    %70 = arith.addf %69, %68 : vector<8x32xf32>
    %71 = arith.divf %69, %70 : vector<8x32xf32>
    %72 = vector.extract_strided_slice %54 {offsets = [0, 64], sizes = [8, 32], strides = [1, 1]} : vector<8x128xf32> to vector<8x32xf32>
    %73 = vector.extract_strided_slice %55 {offsets = [0, 64], sizes = [8, 32], strides = [1, 1]} : vector<8x128xf32> to vector<8x32xf32>
    %74 = arith.addf %73, %19 : vector<8x32xf32>
    %75 = arith.mulf %63, %74 : vector<8x32xf32>
    %76 = arith.addf %72, %75 : vector<8x32xf32>
    %77 = math.tanh %76 : vector<8x32xf32>
    %cst_29 = arith.constant 1.000000e+00 : f32
    %78 = vector.broadcast %cst_29 : f32 to vector<8x32xf32>
    %79 = arith.subf %78, %71 : vector<8x32xf32>
    %80 = arith.mulf %79, %77 : vector<8x32xf32>
    %81 = arith.mulf %71, %20 : vector<8x32xf32>
    %82 = arith.addf %80, %81 : vector<8x32xf32>
    %c1_i32 = arith.constant 1 : i32
    %c8_i32_30 = arith.constant 8 : i32
    %83 = arith.muli %c1_i32, %c8_i32_30 : i32
    %84 = tpu.assume_multiple %83, 8 : i32
    %85 = arith.index_cast %84 : i32 to index
    %c0_31 = arith.constant 0 : index
    %86 = vector.load %arg10[%85, %c0_31] : memref<64x128xf32, #tpu.memory_space<vmem>>, vector<8x128xf32>
    %cst_32 = arith.constant dense<0.000000e+00> : vector<8x128xf32>
    %87 = tpu.matmul %52, %8, %cst_32 {dimension_numbers = #tpu.dot_dimension_numbers<[1], [0], [0], [1], [0, 0, 1, 1], [], []>} : vector<8x32xf32>, vector<32x128xf32>, vector<8x128xf32> -> vector<8x128xf32>
    %88 = vector.extract_strided_slice %86 {offsets = [0, 0], sizes = [8, 32], strides = [1, 1]} : vector<8x128xf32> to vector<8x32xf32>
    %89 = vector.extract_strided_slice %87 {offsets = [0, 0], sizes = [8, 32], strides = [1, 1]} : vector<8x128xf32> to vector<8x32xf32>
    %90 = arith.addf %88, %89 : vector<8x32xf32>
    %91 = arith.negf %90 : vector<8x32xf32>
    %92 = math.exp %91 : vector<8x32xf32>
    %cst_33 = arith.constant 1.000000e+00 : f32
    %93 = vector.broadcast %cst_33 : f32 to vector<8x32xf32>
    %94 = arith.addf %93, %92 : vector<8x32xf32>
    %95 = arith.divf %93, %94 : vector<8x32xf32>
    %96 = vector.extract_strided_slice %86 {offsets = [0, 32], sizes = [8, 32], strides = [1, 1]} : vector<8x128xf32> to vector<8x32xf32>
    %97 = vector.extract_strided_slice %87 {offsets = [0, 32], sizes = [8, 32], strides = [1, 1]} : vector<8x128xf32> to vector<8x32xf32>
    %98 = arith.addf %96, %97 : vector<8x32xf32>
    %99 = arith.negf %98 : vector<8x32xf32>
    %100 = math.exp %99 : vector<8x32xf32>
    %cst_34 = arith.constant 1.000000e+00 : f32
    %101 = vector.broadcast %cst_34 : f32 to vector<8x32xf32>
    %102 = arith.addf %101, %100 : vector<8x32xf32>
    %103 = arith.divf %101, %102 : vector<8x32xf32>
    %104 = vector.extract_strided_slice %86 {offsets = [0, 64], sizes = [8, 32], strides = [1, 1]} : vector<8x128xf32> to vector<8x32xf32>
    %105 = vector.extract_strided_slice %87 {offsets = [0, 64], sizes = [8, 32], strides = [1, 1]} : vector<8x128xf32> to vector<8x32xf32>
    %106 = arith.addf %105, %16 : vector<8x32xf32>
    %107 = arith.mulf %95, %106 : vector<8x32xf32>
    %108 = arith.addf %104, %107 : vector<8x32xf32>
    %109 = math.tanh %108 : vector<8x32xf32>
    %cst_35 = arith.constant 1.000000e+00 : f32
    %110 = vector.broadcast %cst_35 : f32 to vector<8x32xf32>
    %111 = arith.subf %110, %103 : vector<8x32xf32>
    %112 = arith.mulf %111, %109 : vector<8x32xf32>
    %113 = arith.mulf %103, %52 : vector<8x32xf32>
    %114 = arith.addf %112, %113 : vector<8x32xf32>
    %cst_36 = arith.constant dense<0.000000e+00> : vector<8x128xf32>
    %115 = tpu.matmul %114, %9, %cst_36 {dimension_numbers = #tpu.dot_dimension_numbers<[1], [0], [0], [1], [0, 0, 1, 1], [], []>} : vector<8x32xf32>, vector<32x128xf32>, vector<8x128xf32> -> vector<8x128xf32>
    %116 = arith.addf %115, %13 : vector<8x128xf32>
    %cst_37 = arith.constant dense<0.000000e+00> : vector<8x128xf32>
    %117 = tpu.matmul %82, %10, %cst_37 {dimension_numbers = #tpu.dot_dimension_numbers<[1], [0], [0], [1], [0, 0, 1, 1], [], []>} : vector<8x32xf32>, vector<32x128xf32>, vector<8x128xf32> -> vector<8x128xf32>
    %118 = vector.extract_strided_slice %116 {offsets = [0, 0], sizes = [8, 32], strides = [1, 1]} : vector<8x128xf32> to vector<8x32xf32>
    %119 = vector.extract_strided_slice %117 {offsets = [0, 0], sizes = [8, 32], strides = [1, 1]} : vector<8x128xf32> to vector<8x32xf32>
    %120 = arith.addf %118, %119 : vector<8x32xf32>
    %121 = arith.negf %120 : vector<8x32xf32>
    %122 = math.exp %121 : vector<8x32xf32>
    %cst_38 = arith.constant 1.000000e+00 : f32
    %123 = vector.broadcast %cst_38 : f32 to vector<8x32xf32>
    %124 = arith.addf %123, %122 : vector<8x32xf32>
    %125 = arith.divf %123, %124 : vector<8x32xf32>
    %126 = vector.extract_strided_slice %116 {offsets = [0, 32], sizes = [8, 32], strides = [1, 1]} : vector<8x128xf32> to vector<8x32xf32>
    %127 = vector.extract_strided_slice %117 {offsets = [0, 32], sizes = [8, 32], strides = [1, 1]} : vector<8x128xf32> to vector<8x32xf32>
    %128 = arith.addf %126, %127 : vector<8x32xf32>
    %129 = arith.negf %128 : vector<8x32xf32>
    %130 = math.exp %129 : vector<8x32xf32>
    %cst_39 = arith.constant 1.000000e+00 : f32
    %131 = vector.broadcast %cst_39 : f32 to vector<8x32xf32>
    %132 = arith.addf %131, %130 : vector<8x32xf32>
    %133 = arith.divf %131, %132 : vector<8x32xf32>
    %134 = vector.extract_strided_slice %116 {offsets = [0, 64], sizes = [8, 32], strides = [1, 1]} : vector<8x128xf32> to vector<8x32xf32>
    %135 = vector.extract_strided_slice %117 {offsets = [0, 64], sizes = [8, 32], strides = [1, 1]} : vector<8x128xf32> to vector<8x32xf32>
    %136 = arith.addf %135, %19 : vector<8x32xf32>
    %137 = arith.mulf %125, %136 : vector<8x32xf32>
    %138 = arith.addf %134, %137 : vector<8x32xf32>
    %139 = math.tanh %138 : vector<8x32xf32>
    %cst_40 = arith.constant 1.000000e+00 : f32
    %140 = vector.broadcast %cst_40 : f32 to vector<8x32xf32>
    %141 = arith.subf %140, %133 : vector<8x32xf32>
    %142 = arith.mulf %141, %139 : vector<8x32xf32>
    %143 = arith.mulf %133, %82 : vector<8x32xf32>
    %144 = arith.addf %142, %143 : vector<8x32xf32>
    %c2_i32 = arith.constant 2 : i32
    %c8_i32_41 = arith.constant 8 : i32
    %145 = arith.muli %c2_i32, %c8_i32_41 : i32
    %146 = tpu.assume_multiple %145, 8 : i32
    %147 = arith.index_cast %146 : i32 to index
    %c0_42 = arith.constant 0 : index
    %148 = vector.load %arg10[%147, %c0_42] : memref<64x128xf32, #tpu.memory_space<vmem>>, vector<8x128xf32>
    %cst_43 = arith.constant dense<0.000000e+00> : vector<8x128xf32>
    %149 = tpu.matmul %114, %8, %cst_43 {dimension_numbers = #tpu.dot_dimension_numbers<[1], [0], [0], [1], [0, 0, 1, 1], [], []>} : vector<8x32xf32>, vector<32x128xf32>, vector<8x128xf32> -> vector<8x128xf32>
    %150 = vector.extract_strided_slice %148 {offsets = [0, 0], sizes = [8, 32], strides = [1, 1]} : vector<8x128xf32> to vector<8x32xf32>
    %151 = vector.extract_strided_slice %149 {offsets = [0, 0], sizes = [8, 32], strides = [1, 1]} : vector<8x128xf32> to vector<8x32xf32>
    %152 = arith.addf %150, %151 : vector<8x32xf32>
    %153 = arith.negf %152 : vector<8x32xf32>
    %154 = math.exp %153 : vector<8x32xf32>
    %cst_44 = arith.constant 1.000000e+00 : f32
    %155 = vector.broadcast %cst_44 : f32 to vector<8x32xf32>
    %156 = arith.addf %155, %154 : vector<8x32xf32>
    %157 = arith.divf %155, %156 : vector<8x32xf32>
    %158 = vector.extract_strided_slice %148 {offsets = [0, 32], sizes = [8, 32], strides = [1, 1]} : vector<8x128xf32> to vector<8x32xf32>
    %159 = vector.extract_strided_slice %149 {offsets = [0, 32], sizes = [8, 32], strides = [1, 1]} : vector<8x128xf32> to vector<8x32xf32>
    %160 = arith.addf %158, %159 : vector<8x32xf32>
    %161 = arith.negf %160 : vector<8x32xf32>
    %162 = math.exp %161 : vector<8x32xf32>
    %cst_45 = arith.constant 1.000000e+00 : f32
    %163 = vector.broadcast %cst_45 : f32 to vector<8x32xf32>
    %164 = arith.addf %163, %162 : vector<8x32xf32>
    %165 = arith.divf %163, %164 : vector<8x32xf32>
    %166 = vector.extract_strided_slice %148 {offsets = [0, 64], sizes = [8, 32], strides = [1, 1]} : vector<8x128xf32> to vector<8x32xf32>
    %167 = vector.extract_strided_slice %149 {offsets = [0, 64], sizes = [8, 32], strides = [1, 1]} : vector<8x128xf32> to vector<8x32xf32>
    %168 = arith.addf %167, %16 : vector<8x32xf32>
    %169 = arith.mulf %157, %168 : vector<8x32xf32>
    %170 = arith.addf %166, %169 : vector<8x32xf32>
    %171 = math.tanh %170 : vector<8x32xf32>
    %cst_46 = arith.constant 1.000000e+00 : f32
    %172 = vector.broadcast %cst_46 : f32 to vector<8x32xf32>
    %173 = arith.subf %172, %165 : vector<8x32xf32>
    %174 = arith.mulf %173, %171 : vector<8x32xf32>
    %175 = arith.mulf %165, %114 : vector<8x32xf32>
    %176 = arith.addf %174, %175 : vector<8x32xf32>
    %cst_47 = arith.constant dense<0.000000e+00> : vector<8x128xf32>
    %177 = tpu.matmul %176, %9, %cst_47 {dimension_numbers = #tpu.dot_dimension_numbers<[1], [0], [0], [1], [0, 0, 1, 1], [], []>} : vector<8x32xf32>, vector<32x128xf32>, vector<8x128xf32> -> vector<8x128xf32>
    %178 = arith.addf %177, %13 : vector<8x128xf32>
    %cst_48 = arith.constant dense<0.000000e+00> : vector<8x128xf32>
    %179 = tpu.matmul %144, %10, %cst_48 {dimension_numbers = #tpu.dot_dimension_numbers<[1], [0], [0], [1], [0, 0, 1, 1], [], []>} : vector<8x32xf32>, vector<32x128xf32>, vector<8x128xf32> -> vector<8x128xf32>
    %180 = vector.extract_strided_slice %178 {offsets = [0, 0], sizes = [8, 32], strides = [1, 1]} : vector<8x128xf32> to vector<8x32xf32>
    %181 = vector.extract_strided_slice %179 {offsets = [0, 0], sizes = [8, 32], strides = [1, 1]} : vector<8x128xf32> to vector<8x32xf32>
    %182 = arith.addf %180, %181 : vector<8x32xf32>
    %183 = arith.negf %182 : vector<8x32xf32>
    %184 = math.exp %183 : vector<8x32xf32>
    %cst_49 = arith.constant 1.000000e+00 : f32
    %185 = vector.broadcast %cst_49 : f32 to vector<8x32xf32>
    %186 = arith.addf %185, %184 : vector<8x32xf32>
    %187 = arith.divf %185, %186 : vector<8x32xf32>
    %188 = vector.extract_strided_slice %178 {offsets = [0, 32], sizes = [8, 32], strides = [1, 1]} : vector<8x128xf32> to vector<8x32xf32>
    %189 = vector.extract_strided_slice %179 {offsets = [0, 32], sizes = [8, 32], strides = [1, 1]} : vector<8x128xf32> to vector<8x32xf32>
    %190 = arith.addf %188, %189 : vector<8x32xf32>
    %191 = arith.negf %190 : vector<8x32xf32>
    %192 = math.exp %191 : vector<8x32xf32>
    %cst_50 = arith.constant 1.000000e+00 : f32
    %193 = vector.broadcast %cst_50 : f32 to vector<8x32xf32>
    %194 = arith.addf %193, %192 : vector<8x32xf32>
    %195 = arith.divf %193, %194 : vector<8x32xf32>
    %196 = vector.extract_strided_slice %178 {offsets = [0, 64], sizes = [8, 32], strides = [1, 1]} : vector<8x128xf32> to vector<8x32xf32>
    %197 = vector.extract_strided_slice %179 {offsets = [0, 64], sizes = [8, 32], strides = [1, 1]} : vector<8x128xf32> to vector<8x32xf32>
    %198 = arith.addf %197, %19 : vector<8x32xf32>
    %199 = arith.mulf %187, %198 : vector<8x32xf32>
    %200 = arith.addf %196, %199 : vector<8x32xf32>
    %201 = math.tanh %200 : vector<8x32xf32>
    %cst_51 = arith.constant 1.000000e+00 : f32
    %202 = vector.broadcast %cst_51 : f32 to vector<8x32xf32>
    %203 = arith.subf %202, %195 : vector<8x32xf32>
    %204 = arith.mulf %203, %201 : vector<8x32xf32>
    %205 = arith.mulf %195, %144 : vector<8x32xf32>
    %206 = arith.addf %204, %205 : vector<8x32xf32>
    %c3_i32 = arith.constant 3 : i32
    %c8_i32_52 = arith.constant 8 : i32
    %207 = arith.muli %c3_i32, %c8_i32_52 : i32
    %208 = tpu.assume_multiple %207, 8 : i32
    %209 = arith.index_cast %208 : i32 to index
    %c0_53 = arith.constant 0 : index
    %210 = vector.load %arg10[%209, %c0_53] : memref<64x128xf32, #tpu.memory_space<vmem>>, vector<8x128xf32>
    %cst_54 = arith.constant dense<0.000000e+00> : vector<8x128xf32>
    %211 = tpu.matmul %176, %8, %cst_54 {dimension_numbers = #tpu.dot_dimension_numbers<[1], [0], [0], [1], [0, 0, 1, 1], [], []>} : vector<8x32xf32>, vector<32x128xf32>, vector<8x128xf32> -> vector<8x128xf32>
    %212 = vector.extract_strided_slice %210 {offsets = [0, 0], sizes = [8, 32], strides = [1, 1]} : vector<8x128xf32> to vector<8x32xf32>
    %213 = vector.extract_strided_slice %211 {offsets = [0, 0], sizes = [8, 32], strides = [1, 1]} : vector<8x128xf32> to vector<8x32xf32>
    %214 = arith.addf %212, %213 : vector<8x32xf32>
    %215 = arith.negf %214 : vector<8x32xf32>
    %216 = math.exp %215 : vector<8x32xf32>
    %cst_55 = arith.constant 1.000000e+00 : f32
    %217 = vector.broadcast %cst_55 : f32 to vector<8x32xf32>
    %218 = arith.addf %217, %216 : vector<8x32xf32>
    %219 = arith.divf %217, %218 : vector<8x32xf32>
    %220 = vector.extract_strided_slice %210 {offsets = [0, 32], sizes = [8, 32], strides = [1, 1]} : vector<8x128xf32> to vector<8x32xf32>
    %221 = vector.extract_strided_slice %211 {offsets = [0, 32], sizes = [8, 32], strides = [1, 1]} : vector<8x128xf32> to vector<8x32xf32>
    %222 = arith.addf %220, %221 : vector<8x32xf32>
    %223 = arith.negf %222 : vector<8x32xf32>
    %224 = math.exp %223 : vector<8x32xf32>
    %cst_56 = arith.constant 1.000000e+00 : f32
    %225 = vector.broadcast %cst_56 : f32 to vector<8x32xf32>
    %226 = arith.addf %225, %224 : vector<8x32xf32>
    %227 = arith.divf %225, %226 : vector<8x32xf32>
    %228 = vector.extract_strided_slice %210 {offsets = [0, 64], sizes = [8, 32], strides = [1, 1]} : vector<8x128xf32> to vector<8x32xf32>
    %229 = vector.extract_strided_slice %211 {offsets = [0, 64], sizes = [8, 32], strides = [1, 1]} : vector<8x128xf32> to vector<8x32xf32>
    %230 = arith.addf %229, %16 : vector<8x32xf32>
    %231 = arith.mulf %219, %230 : vector<8x32xf32>
    %232 = arith.addf %228, %231 : vector<8x32xf32>
    %233 = math.tanh %232 : vector<8x32xf32>
    %cst_57 = arith.constant 1.000000e+00 : f32
    %234 = vector.broadcast %cst_57 : f32 to vector<8x32xf32>
    %235 = arith.subf %234, %227 : vector<8x32xf32>
    %236 = arith.mulf %235, %233 : vector<8x32xf32>
    %237 = arith.mulf %227, %176 : vector<8x32xf32>
    %238 = arith.addf %236, %237 : vector<8x32xf32>
    %cst_58 = arith.constant dense<0.000000e+00> : vector<8x128xf32>
    %239 = tpu.matmul %238, %9, %cst_58 {dimension_numbers = #tpu.dot_dimension_numbers<[1], [0], [0], [1], [0, 0, 1, 1], [], []>} : vector<8x32xf32>, vector<32x128xf32>, vector<8x128xf32> -> vector<8x128xf32>
    %240 = arith.addf %239, %13 : vector<8x128xf32>
    %cst_59 = arith.constant dense<0.000000e+00> : vector<8x128xf32>
    %241 = tpu.matmul %206, %10, %cst_59 {dimension_numbers = #tpu.dot_dimension_numbers<[1], [0], [0], [1], [0, 0, 1, 1], [], []>} : vector<8x32xf32>, vector<32x128xf32>, vector<8x128xf32> -> vector<8x128xf32>
    %242 = vector.extract_strided_slice %240 {offsets = [0, 0], sizes = [8, 32], strides = [1, 1]} : vector<8x128xf32> to vector<8x32xf32>
    %243 = vector.extract_strided_slice %241 {offsets = [0, 0], sizes = [8, 32], strides = [1, 1]} : vector<8x128xf32> to vector<8x32xf32>
    %244 = arith.addf %242, %243 : vector<8x32xf32>
    %245 = arith.negf %244 : vector<8x32xf32>
    %246 = math.exp %245 : vector<8x32xf32>
    %cst_60 = arith.constant 1.000000e+00 : f32
    %247 = vector.broadcast %cst_60 : f32 to vector<8x32xf32>
    %248 = arith.addf %247, %246 : vector<8x32xf32>
    %249 = arith.divf %247, %248 : vector<8x32xf32>
    %250 = vector.extract_strided_slice %240 {offsets = [0, 32], sizes = [8, 32], strides = [1, 1]} : vector<8x128xf32> to vector<8x32xf32>
    %251 = vector.extract_strided_slice %241 {offsets = [0, 32], sizes = [8, 32], strides = [1, 1]} : vector<8x128xf32> to vector<8x32xf32>
    %252 = arith.addf %250, %251 : vector<8x32xf32>
    %253 = arith.negf %252 : vector<8x32xf32>
    %254 = math.exp %253 : vector<8x32xf32>
    %cst_61 = arith.constant 1.000000e+00 : f32
    %255 = vector.broadcast %cst_61 : f32 to vector<8x32xf32>
    %256 = arith.addf %255, %254 : vector<8x32xf32>
    %257 = arith.divf %255, %256 : vector<8x32xf32>
    %258 = vector.extract_strided_slice %240 {offsets = [0, 64], sizes = [8, 32], strides = [1, 1]} : vector<8x128xf32> to vector<8x32xf32>
    %259 = vector.extract_strided_slice %241 {offsets = [0, 64], sizes = [8, 32], strides = [1, 1]} : vector<8x128xf32> to vector<8x32xf32>
    %260 = arith.addf %259, %19 : vector<8x32xf32>
    %261 = arith.mulf %249, %260 : vector<8x32xf32>
    %262 = arith.addf %258, %261 : vector<8x32xf32>
    %263 = math.tanh %262 : vector<8x32xf32>
    %cst_62 = arith.constant 1.000000e+00 : f32
    %264 = vector.broadcast %cst_62 : f32 to vector<8x32xf32>
    %265 = arith.subf %264, %257 : vector<8x32xf32>
    %266 = arith.mulf %265, %263 : vector<8x32xf32>
    %267 = arith.mulf %257, %206 : vector<8x32xf32>
    %268 = arith.addf %266, %267 : vector<8x32xf32>
    %c4_i32 = arith.constant 4 : i32
    %c8_i32_63 = arith.constant 8 : i32
    %269 = arith.muli %c4_i32, %c8_i32_63 : i32
    %270 = tpu.assume_multiple %269, 8 : i32
    %271 = arith.index_cast %270 : i32 to index
    %c0_64 = arith.constant 0 : index
    %272 = vector.load %arg10[%271, %c0_64] : memref<64x128xf32, #tpu.memory_space<vmem>>, vector<8x128xf32>
    %cst_65 = arith.constant dense<0.000000e+00> : vector<8x128xf32>
    %273 = tpu.matmul %238, %8, %cst_65 {dimension_numbers = #tpu.dot_dimension_numbers<[1], [0], [0], [1], [0, 0, 1, 1], [], []>} : vector<8x32xf32>, vector<32x128xf32>, vector<8x128xf32> -> vector<8x128xf32>
    %274 = vector.extract_strided_slice %272 {offsets = [0, 0], sizes = [8, 32], strides = [1, 1]} : vector<8x128xf32> to vector<8x32xf32>
    %275 = vector.extract_strided_slice %273 {offsets = [0, 0], sizes = [8, 32], strides = [1, 1]} : vector<8x128xf32> to vector<8x32xf32>
    %276 = arith.addf %274, %275 : vector<8x32xf32>
    %277 = arith.negf %276 : vector<8x32xf32>
    %278 = math.exp %277 : vector<8x32xf32>
    %cst_66 = arith.constant 1.000000e+00 : f32
    %279 = vector.broadcast %cst_66 : f32 to vector<8x32xf32>
    %280 = arith.addf %279, %278 : vector<8x32xf32>
    %281 = arith.divf %279, %280 : vector<8x32xf32>
    %282 = vector.extract_strided_slice %272 {offsets = [0, 32], sizes = [8, 32], strides = [1, 1]} : vector<8x128xf32> to vector<8x32xf32>
    %283 = vector.extract_strided_slice %273 {offsets = [0, 32], sizes = [8, 32], strides = [1, 1]} : vector<8x128xf32> to vector<8x32xf32>
    %284 = arith.addf %282, %283 : vector<8x32xf32>
    %285 = arith.negf %284 : vector<8x32xf32>
    %286 = math.exp %285 : vector<8x32xf32>
    %cst_67 = arith.constant 1.000000e+00 : f32
    %287 = vector.broadcast %cst_67 : f32 to vector<8x32xf32>
    %288 = arith.addf %287, %286 : vector<8x32xf32>
    %289 = arith.divf %287, %288 : vector<8x32xf32>
    %290 = vector.extract_strided_slice %272 {offsets = [0, 64], sizes = [8, 32], strides = [1, 1]} : vector<8x128xf32> to vector<8x32xf32>
    %291 = vector.extract_strided_slice %273 {offsets = [0, 64], sizes = [8, 32], strides = [1, 1]} : vector<8x128xf32> to vector<8x32xf32>
    %292 = arith.addf %291, %16 : vector<8x32xf32>
    %293 = arith.mulf %281, %292 : vector<8x32xf32>
    %294 = arith.addf %290, %293 : vector<8x32xf32>
    %295 = math.tanh %294 : vector<8x32xf32>
    %cst_68 = arith.constant 1.000000e+00 : f32
    %296 = vector.broadcast %cst_68 : f32 to vector<8x32xf32>
    %297 = arith.subf %296, %289 : vector<8x32xf32>
    %298 = arith.mulf %297, %295 : vector<8x32xf32>
    %299 = arith.mulf %289, %238 : vector<8x32xf32>
    %300 = arith.addf %298, %299 : vector<8x32xf32>
    %cst_69 = arith.constant dense<0.000000e+00> : vector<8x128xf32>
    %301 = tpu.matmul %300, %9, %cst_69 {dimension_numbers = #tpu.dot_dimension_numbers<[1], [0], [0], [1], [0, 0, 1, 1], [], []>} : vector<8x32xf32>, vector<32x128xf32>, vector<8x128xf32> -> vector<8x128xf32>
    %302 = arith.addf %301, %13 : vector<8x128xf32>
    %cst_70 = arith.constant dense<0.000000e+00> : vector<8x128xf32>
    %303 = tpu.matmul %268, %10, %cst_70 {dimension_numbers = #tpu.dot_dimension_numbers<[1], [0], [0], [1], [0, 0, 1, 1], [], []>} : vector<8x32xf32>, vector<32x128xf32>, vector<8x128xf32> -> vector<8x128xf32>
    %304 = vector.extract_strided_slice %302 {offsets = [0, 0], sizes = [8, 32], strides = [1, 1]} : vector<8x128xf32> to vector<8x32xf32>
    %305 = vector.extract_strided_slice %303 {offsets = [0, 0], sizes = [8, 32], strides = [1, 1]} : vector<8x128xf32> to vector<8x32xf32>
    %306 = arith.addf %304, %305 : vector<8x32xf32>
    %307 = arith.negf %306 : vector<8x32xf32>
    %308 = math.exp %307 : vector<8x32xf32>
    %cst_71 = arith.constant 1.000000e+00 : f32
    %309 = vector.broadcast %cst_71 : f32 to vector<8x32xf32>
    %310 = arith.addf %309, %308 : vector<8x32xf32>
    %311 = arith.divf %309, %310 : vector<8x32xf32>
    %312 = vector.extract_strided_slice %302 {offsets = [0, 32], sizes = [8, 32], strides = [1, 1]} : vector<8x128xf32> to vector<8x32xf32>
    %313 = vector.extract_strided_slice %303 {offsets = [0, 32], sizes = [8, 32], strides = [1, 1]} : vector<8x128xf32> to vector<8x32xf32>
    %314 = arith.addf %312, %313 : vector<8x32xf32>
    %315 = arith.negf %314 : vector<8x32xf32>
    %316 = math.exp %315 : vector<8x32xf32>
    %cst_72 = arith.constant 1.000000e+00 : f32
    %317 = vector.broadcast %cst_72 : f32 to vector<8x32xf32>
    %318 = arith.addf %317, %316 : vector<8x32xf32>
    %319 = arith.divf %317, %318 : vector<8x32xf32>
    %320 = vector.extract_strided_slice %302 {offsets = [0, 64], sizes = [8, 32], strides = [1, 1]} : vector<8x128xf32> to vector<8x32xf32>
    %321 = vector.extract_strided_slice %303 {offsets = [0, 64], sizes = [8, 32], strides = [1, 1]} : vector<8x128xf32> to vector<8x32xf32>
    %322 = arith.addf %321, %19 : vector<8x32xf32>
    %323 = arith.mulf %311, %322 : vector<8x32xf32>
    %324 = arith.addf %320, %323 : vector<8x32xf32>
    %325 = math.tanh %324 : vector<8x32xf32>
    %cst_73 = arith.constant 1.000000e+00 : f32
    %326 = vector.broadcast %cst_73 : f32 to vector<8x32xf32>
    %327 = arith.subf %326, %319 : vector<8x32xf32>
    %328 = arith.mulf %327, %325 : vector<8x32xf32>
    %329 = arith.mulf %319, %268 : vector<8x32xf32>
    %330 = arith.addf %328, %329 : vector<8x32xf32>
    %c5_i32 = arith.constant 5 : i32
    %c8_i32_74 = arith.constant 8 : i32
    %331 = arith.muli %c5_i32, %c8_i32_74 : i32
    %332 = tpu.assume_multiple %331, 8 : i32
    %333 = arith.index_cast %332 : i32 to index
    %c0_75 = arith.constant 0 : index
    %334 = vector.load %arg10[%333, %c0_75] : memref<64x128xf32, #tpu.memory_space<vmem>>, vector<8x128xf32>
    %cst_76 = arith.constant dense<0.000000e+00> : vector<8x128xf32>
    %335 = tpu.matmul %300, %8, %cst_76 {dimension_numbers = #tpu.dot_dimension_numbers<[1], [0], [0], [1], [0, 0, 1, 1], [], []>} : vector<8x32xf32>, vector<32x128xf32>, vector<8x128xf32> -> vector<8x128xf32>
    %336 = vector.extract_strided_slice %334 {offsets = [0, 0], sizes = [8, 32], strides = [1, 1]} : vector<8x128xf32> to vector<8x32xf32>
    %337 = vector.extract_strided_slice %335 {offsets = [0, 0], sizes = [8, 32], strides = [1, 1]} : vector<8x128xf32> to vector<8x32xf32>
    %338 = arith.addf %336, %337 : vector<8x32xf32>
    %339 = arith.negf %338 : vector<8x32xf32>
    %340 = math.exp %339 : vector<8x32xf32>
    %cst_77 = arith.constant 1.000000e+00 : f32
    %341 = vector.broadcast %cst_77 : f32 to vector<8x32xf32>
    %342 = arith.addf %341, %340 : vector<8x32xf32>
    %343 = arith.divf %341, %342 : vector<8x32xf32>
    %344 = vector.extract_strided_slice %334 {offsets = [0, 32], sizes = [8, 32], strides = [1, 1]} : vector<8x128xf32> to vector<8x32xf32>
    %345 = vector.extract_strided_slice %335 {offsets = [0, 32], sizes = [8, 32], strides = [1, 1]} : vector<8x128xf32> to vector<8x32xf32>
    %346 = arith.addf %344, %345 : vector<8x32xf32>
    %347 = arith.negf %346 : vector<8x32xf32>
    %348 = math.exp %347 : vector<8x32xf32>
    %cst_78 = arith.constant 1.000000e+00 : f32
    %349 = vector.broadcast %cst_78 : f32 to vector<8x32xf32>
    %350 = arith.addf %349, %348 : vector<8x32xf32>
    %351 = arith.divf %349, %350 : vector<8x32xf32>
    %352 = vector.extract_strided_slice %334 {offsets = [0, 64], sizes = [8, 32], strides = [1, 1]} : vector<8x128xf32> to vector<8x32xf32>
    %353 = vector.extract_strided_slice %335 {offsets = [0, 64], sizes = [8, 32], strides = [1, 1]} : vector<8x128xf32> to vector<8x32xf32>
    %354 = arith.addf %353, %16 : vector<8x32xf32>
    %355 = arith.mulf %343, %354 : vector<8x32xf32>
    %356 = arith.addf %352, %355 : vector<8x32xf32>
    %357 = math.tanh %356 : vector<8x32xf32>
    %cst_79 = arith.constant 1.000000e+00 : f32
    %358 = vector.broadcast %cst_79 : f32 to vector<8x32xf32>
    %359 = arith.subf %358, %351 : vector<8x32xf32>
    %360 = arith.mulf %359, %357 : vector<8x32xf32>
    %361 = arith.mulf %351, %300 : vector<8x32xf32>
    %362 = arith.addf %360, %361 : vector<8x32xf32>
    %cst_80 = arith.constant dense<0.000000e+00> : vector<8x128xf32>
    %363 = tpu.matmul %362, %9, %cst_80 {dimension_numbers = #tpu.dot_dimension_numbers<[1], [0], [0], [1], [0, 0, 1, 1], [], []>} : vector<8x32xf32>, vector<32x128xf32>, vector<8x128xf32> -> vector<8x128xf32>
    %364 = arith.addf %363, %13 : vector<8x128xf32>
    %cst_81 = arith.constant dense<0.000000e+00> : vector<8x128xf32>
    %365 = tpu.matmul %330, %10, %cst_81 {dimension_numbers = #tpu.dot_dimension_numbers<[1], [0], [0], [1], [0, 0, 1, 1], [], []>} : vector<8x32xf32>, vector<32x128xf32>, vector<8x128xf32> -> vector<8x128xf32>
    %366 = vector.extract_strided_slice %364 {offsets = [0, 0], sizes = [8, 32], strides = [1, 1]} : vector<8x128xf32> to vector<8x32xf32>
    %367 = vector.extract_strided_slice %365 {offsets = [0, 0], sizes = [8, 32], strides = [1, 1]} : vector<8x128xf32> to vector<8x32xf32>
    %368 = arith.addf %366, %367 : vector<8x32xf32>
    %369 = arith.negf %368 : vector<8x32xf32>
    %370 = math.exp %369 : vector<8x32xf32>
    %cst_82 = arith.constant 1.000000e+00 : f32
    %371 = vector.broadcast %cst_82 : f32 to vector<8x32xf32>
    %372 = arith.addf %371, %370 : vector<8x32xf32>
    %373 = arith.divf %371, %372 : vector<8x32xf32>
    %374 = vector.extract_strided_slice %364 {offsets = [0, 32], sizes = [8, 32], strides = [1, 1]} : vector<8x128xf32> to vector<8x32xf32>
    %375 = vector.extract_strided_slice %365 {offsets = [0, 32], sizes = [8, 32], strides = [1, 1]} : vector<8x128xf32> to vector<8x32xf32>
    %376 = arith.addf %374, %375 : vector<8x32xf32>
    %377 = arith.negf %376 : vector<8x32xf32>
    %378 = math.exp %377 : vector<8x32xf32>
    %cst_83 = arith.constant 1.000000e+00 : f32
    %379 = vector.broadcast %cst_83 : f32 to vector<8x32xf32>
    %380 = arith.addf %379, %378 : vector<8x32xf32>
    %381 = arith.divf %379, %380 : vector<8x32xf32>
    %382 = vector.extract_strided_slice %364 {offsets = [0, 64], sizes = [8, 32], strides = [1, 1]} : vector<8x128xf32> to vector<8x32xf32>
    %383 = vector.extract_strided_slice %365 {offsets = [0, 64], sizes = [8, 32], strides = [1, 1]} : vector<8x128xf32> to vector<8x32xf32>
    %384 = arith.addf %383, %19 : vector<8x32xf32>
    %385 = arith.mulf %373, %384 : vector<8x32xf32>
    %386 = arith.addf %382, %385 : vector<8x32xf32>
    %387 = math.tanh %386 : vector<8x32xf32>
    %cst_84 = arith.constant 1.000000e+00 : f32
    %388 = vector.broadcast %cst_84 : f32 to vector<8x32xf32>
    %389 = arith.subf %388, %381 : vector<8x32xf32>
    %390 = arith.mulf %389, %387 : vector<8x32xf32>
    %391 = arith.mulf %381, %330 : vector<8x32xf32>
    %392 = arith.addf %390, %391 : vector<8x32xf32>
    %c6_i32 = arith.constant 6 : i32
    %c8_i32_85 = arith.constant 8 : i32
    %393 = arith.muli %c6_i32, %c8_i32_85 : i32
    %394 = tpu.assume_multiple %393, 8 : i32
    %395 = arith.index_cast %394 : i32 to index
    %c0_86 = arith.constant 0 : index
    %396 = vector.load %arg10[%395, %c0_86] : memref<64x128xf32, #tpu.memory_space<vmem>>, vector<8x128xf32>
    %cst_87 = arith.constant dense<0.000000e+00> : vector<8x128xf32>
    %397 = tpu.matmul %362, %8, %cst_87 {dimension_numbers = #tpu.dot_dimension_numbers<[1], [0], [0], [1], [0, 0, 1, 1], [], []>} : vector<8x32xf32>, vector<32x128xf32>, vector<8x128xf32> -> vector<8x128xf32>
    %398 = vector.extract_strided_slice %396 {offsets = [0, 0], sizes = [8, 32], strides = [1, 1]} : vector<8x128xf32> to vector<8x32xf32>
    %399 = vector.extract_strided_slice %397 {offsets = [0, 0], sizes = [8, 32], strides = [1, 1]} : vector<8x128xf32> to vector<8x32xf32>
    %400 = arith.addf %398, %399 : vector<8x32xf32>
    %401 = arith.negf %400 : vector<8x32xf32>
    %402 = math.exp %401 : vector<8x32xf32>
    %cst_88 = arith.constant 1.000000e+00 : f32
    %403 = vector.broadcast %cst_88 : f32 to vector<8x32xf32>
    %404 = arith.addf %403, %402 : vector<8x32xf32>
    %405 = arith.divf %403, %404 : vector<8x32xf32>
    %406 = vector.extract_strided_slice %396 {offsets = [0, 32], sizes = [8, 32], strides = [1, 1]} : vector<8x128xf32> to vector<8x32xf32>
    %407 = vector.extract_strided_slice %397 {offsets = [0, 32], sizes = [8, 32], strides = [1, 1]} : vector<8x128xf32> to vector<8x32xf32>
    %408 = arith.addf %406, %407 : vector<8x32xf32>
    %409 = arith.negf %408 : vector<8x32xf32>
    %410 = math.exp %409 : vector<8x32xf32>
    %cst_89 = arith.constant 1.000000e+00 : f32
    %411 = vector.broadcast %cst_89 : f32 to vector<8x32xf32>
    %412 = arith.addf %411, %410 : vector<8x32xf32>
    %413 = arith.divf %411, %412 : vector<8x32xf32>
    %414 = vector.extract_strided_slice %396 {offsets = [0, 64], sizes = [8, 32], strides = [1, 1]} : vector<8x128xf32> to vector<8x32xf32>
    %415 = vector.extract_strided_slice %397 {offsets = [0, 64], sizes = [8, 32], strides = [1, 1]} : vector<8x128xf32> to vector<8x32xf32>
    %416 = arith.addf %415, %16 : vector<8x32xf32>
    %417 = arith.mulf %405, %416 : vector<8x32xf32>
    %418 = arith.addf %414, %417 : vector<8x32xf32>
    %419 = math.tanh %418 : vector<8x32xf32>
    %cst_90 = arith.constant 1.000000e+00 : f32
    %420 = vector.broadcast %cst_90 : f32 to vector<8x32xf32>
    %421 = arith.subf %420, %413 : vector<8x32xf32>
    %422 = arith.mulf %421, %419 : vector<8x32xf32>
    %423 = arith.mulf %413, %362 : vector<8x32xf32>
    %424 = arith.addf %422, %423 : vector<8x32xf32>
    %cst_91 = arith.constant dense<0.000000e+00> : vector<8x128xf32>
    %425 = tpu.matmul %424, %9, %cst_91 {dimension_numbers = #tpu.dot_dimension_numbers<[1], [0], [0], [1], [0, 0, 1, 1], [], []>} : vector<8x32xf32>, vector<32x128xf32>, vector<8x128xf32> -> vector<8x128xf32>
    %426 = arith.addf %425, %13 : vector<8x128xf32>
    %cst_92 = arith.constant dense<0.000000e+00> : vector<8x128xf32>
    %427 = tpu.matmul %392, %10, %cst_92 {dimension_numbers = #tpu.dot_dimension_numbers<[1], [0], [0], [1], [0, 0, 1, 1], [], []>} : vector<8x32xf32>, vector<32x128xf32>, vector<8x128xf32> -> vector<8x128xf32>
    %428 = vector.extract_strided_slice %426 {offsets = [0, 0], sizes = [8, 32], strides = [1, 1]} : vector<8x128xf32> to vector<8x32xf32>
    %429 = vector.extract_strided_slice %427 {offsets = [0, 0], sizes = [8, 32], strides = [1, 1]} : vector<8x128xf32> to vector<8x32xf32>
    %430 = arith.addf %428, %429 : vector<8x32xf32>
    %431 = arith.negf %430 : vector<8x32xf32>
    %432 = math.exp %431 : vector<8x32xf32>
    %cst_93 = arith.constant 1.000000e+00 : f32
    %433 = vector.broadcast %cst_93 : f32 to vector<8x32xf32>
    %434 = arith.addf %433, %432 : vector<8x32xf32>
    %435 = arith.divf %433, %434 : vector<8x32xf32>
    %436 = vector.extract_strided_slice %426 {offsets = [0, 32], sizes = [8, 32], strides = [1, 1]} : vector<8x128xf32> to vector<8x32xf32>
    %437 = vector.extract_strided_slice %427 {offsets = [0, 32], sizes = [8, 32], strides = [1, 1]} : vector<8x128xf32> to vector<8x32xf32>
    %438 = arith.addf %436, %437 : vector<8x32xf32>
    %439 = arith.negf %438 : vector<8x32xf32>
    %440 = math.exp %439 : vector<8x32xf32>
    %cst_94 = arith.constant 1.000000e+00 : f32
    %441 = vector.broadcast %cst_94 : f32 to vector<8x32xf32>
    %442 = arith.addf %441, %440 : vector<8x32xf32>
    %443 = arith.divf %441, %442 : vector<8x32xf32>
    %444 = vector.extract_strided_slice %426 {offsets = [0, 64], sizes = [8, 32], strides = [1, 1]} : vector<8x128xf32> to vector<8x32xf32>
    %445 = vector.extract_strided_slice %427 {offsets = [0, 64], sizes = [8, 32], strides = [1, 1]} : vector<8x128xf32> to vector<8x32xf32>
    %446 = arith.addf %445, %19 : vector<8x32xf32>
    %447 = arith.mulf %435, %446 : vector<8x32xf32>
    %448 = arith.addf %444, %447 : vector<8x32xf32>
    %449 = math.tanh %448 : vector<8x32xf32>
    %cst_95 = arith.constant 1.000000e+00 : f32
    %450 = vector.broadcast %cst_95 : f32 to vector<8x32xf32>
    %451 = arith.subf %450, %443 : vector<8x32xf32>
    %452 = arith.mulf %451, %449 : vector<8x32xf32>
    %453 = arith.mulf %443, %392 : vector<8x32xf32>
    %454 = arith.addf %452, %453 : vector<8x32xf32>
    %c7_i32 = arith.constant 7 : i32
    %c8_i32_96 = arith.constant 8 : i32
    %455 = arith.muli %c7_i32, %c8_i32_96 : i32
    %456 = tpu.assume_multiple %455, 8 : i32
    %457 = arith.index_cast %456 : i32 to index
    %c0_97 = arith.constant 0 : index
    %458 = vector.load %arg10[%457, %c0_97] : memref<64x128xf32, #tpu.memory_space<vmem>>, vector<8x128xf32>
    %cst_98 = arith.constant dense<0.000000e+00> : vector<8x128xf32>
    %459 = tpu.matmul %424, %8, %cst_98 {dimension_numbers = #tpu.dot_dimension_numbers<[1], [0], [0], [1], [0, 0, 1, 1], [], []>} : vector<8x32xf32>, vector<32x128xf32>, vector<8x128xf32> -> vector<8x128xf32>
    %460 = vector.extract_strided_slice %458 {offsets = [0, 0], sizes = [8, 32], strides = [1, 1]} : vector<8x128xf32> to vector<8x32xf32>
    %461 = vector.extract_strided_slice %459 {offsets = [0, 0], sizes = [8, 32], strides = [1, 1]} : vector<8x128xf32> to vector<8x32xf32>
    %462 = arith.addf %460, %461 : vector<8x32xf32>
    %463 = arith.negf %462 : vector<8x32xf32>
    %464 = math.exp %463 : vector<8x32xf32>
    %cst_99 = arith.constant 1.000000e+00 : f32
    %465 = vector.broadcast %cst_99 : f32 to vector<8x32xf32>
    %466 = arith.addf %465, %464 : vector<8x32xf32>
    %467 = arith.divf %465, %466 : vector<8x32xf32>
    %468 = vector.extract_strided_slice %458 {offsets = [0, 32], sizes = [8, 32], strides = [1, 1]} : vector<8x128xf32> to vector<8x32xf32>
    %469 = vector.extract_strided_slice %459 {offsets = [0, 32], sizes = [8, 32], strides = [1, 1]} : vector<8x128xf32> to vector<8x32xf32>
    %470 = arith.addf %468, %469 : vector<8x32xf32>
    %471 = arith.negf %470 : vector<8x32xf32>
    %472 = math.exp %471 : vector<8x32xf32>
    %cst_100 = arith.constant 1.000000e+00 : f32
    %473 = vector.broadcast %cst_100 : f32 to vector<8x32xf32>
    %474 = arith.addf %473, %472 : vector<8x32xf32>
    %475 = arith.divf %473, %474 : vector<8x32xf32>
    %476 = vector.extract_strided_slice %458 {offsets = [0, 64], sizes = [8, 32], strides = [1, 1]} : vector<8x128xf32> to vector<8x32xf32>
    %477 = vector.extract_strided_slice %459 {offsets = [0, 64], sizes = [8, 32], strides = [1, 1]} : vector<8x128xf32> to vector<8x32xf32>
    %478 = arith.addf %477, %16 : vector<8x32xf32>
    %479 = arith.mulf %467, %478 : vector<8x32xf32>
    %480 = arith.addf %476, %479 : vector<8x32xf32>
    %481 = math.tanh %480 : vector<8x32xf32>
    %cst_101 = arith.constant 1.000000e+00 : f32
    %482 = vector.broadcast %cst_101 : f32 to vector<8x32xf32>
    %483 = arith.subf %482, %475 : vector<8x32xf32>
    %484 = arith.mulf %483, %481 : vector<8x32xf32>
    %485 = arith.mulf %475, %424 : vector<8x32xf32>
    %486 = arith.addf %484, %485 : vector<8x32xf32>
    %cst_102 = arith.constant dense<0.000000e+00> : vector<8x128xf32>
    %487 = tpu.matmul %486, %9, %cst_102 {dimension_numbers = #tpu.dot_dimension_numbers<[1], [0], [0], [1], [0, 0, 1, 1], [], []>} : vector<8x32xf32>, vector<32x128xf32>, vector<8x128xf32> -> vector<8x128xf32>
    %488 = arith.addf %487, %13 : vector<8x128xf32>
    %cst_103 = arith.constant dense<0.000000e+00> : vector<8x128xf32>
    %489 = tpu.matmul %454, %10, %cst_103 {dimension_numbers = #tpu.dot_dimension_numbers<[1], [0], [0], [1], [0, 0, 1, 1], [], []>} : vector<8x32xf32>, vector<32x128xf32>, vector<8x128xf32> -> vector<8x128xf32>
    %490 = vector.extract_strided_slice %488 {offsets = [0, 0], sizes = [8, 32], strides = [1, 1]} : vector<8x128xf32> to vector<8x32xf32>
    %491 = vector.extract_strided_slice %489 {offsets = [0, 0], sizes = [8, 32], strides = [1, 1]} : vector<8x128xf32> to vector<8x32xf32>
    %492 = arith.addf %490, %491 : vector<8x32xf32>
    %493 = arith.negf %492 : vector<8x32xf32>
    %494 = math.exp %493 : vector<8x32xf32>
    %cst_104 = arith.constant 1.000000e+00 : f32
    %495 = vector.broadcast %cst_104 : f32 to vector<8x32xf32>
    %496 = arith.addf %495, %494 : vector<8x32xf32>
    %497 = arith.divf %495, %496 : vector<8x32xf32>
    %498 = vector.extract_strided_slice %488 {offsets = [0, 32], sizes = [8, 32], strides = [1, 1]} : vector<8x128xf32> to vector<8x32xf32>
    %499 = vector.extract_strided_slice %489 {offsets = [0, 32], sizes = [8, 32], strides = [1, 1]} : vector<8x128xf32> to vector<8x32xf32>
    %500 = arith.addf %498, %499 : vector<8x32xf32>
    %501 = arith.negf %500 : vector<8x32xf32>
    %502 = math.exp %501 : vector<8x32xf32>
    %cst_105 = arith.constant 1.000000e+00 : f32
    %503 = vector.broadcast %cst_105 : f32 to vector<8x32xf32>
    %504 = arith.addf %503, %502 : vector<8x32xf32>
    %505 = arith.divf %503, %504 : vector<8x32xf32>
    %506 = vector.extract_strided_slice %488 {offsets = [0, 64], sizes = [8, 32], strides = [1, 1]} : vector<8x128xf32> to vector<8x32xf32>
    %507 = vector.extract_strided_slice %489 {offsets = [0, 64], sizes = [8, 32], strides = [1, 1]} : vector<8x128xf32> to vector<8x32xf32>
    %508 = arith.addf %507, %19 : vector<8x32xf32>
    %509 = arith.mulf %497, %508 : vector<8x32xf32>
    %510 = arith.addf %506, %509 : vector<8x32xf32>
    %511 = math.tanh %510 : vector<8x32xf32>
    %cst_106 = arith.constant 1.000000e+00 : f32
    %512 = vector.broadcast %cst_106 : f32 to vector<8x32xf32>
    %513 = arith.subf %512, %505 : vector<8x32xf32>
    %514 = arith.mulf %513, %511 : vector<8x32xf32>
    %515 = arith.mulf %505, %454 : vector<8x32xf32>
    %516 = arith.addf %514, %515 : vector<8x32xf32>
    %c8_i32_107 = arith.constant 8 : i32
    %c0_108 = arith.constant 0 : index
    %c0_109 = arith.constant 0 : index
    %c0_110 = arith.constant 0 : index
    %517 = vector.load %arg9[%c0_108, %c0_109, %c0_110] : memref<2x8x32xf32, #tpu.memory_space<vmem>>, vector<1x8x32xf32>
    %518 = vector.shape_cast %517 : vector<1x8x32xf32> to vector<8x32xf32>
    %519 = vector.shape_cast %486 : vector<8x32xf32> to vector<1x8x32xf32>
    tpu.vector_store %arg9[%c0_108, %c0_109, %c0_110], %519 {strides = array<i32>} : memref<2x8x32xf32, #tpu.memory_space<vmem>>, vector<1x8x32xf32>,
    %c1 = arith.constant 1 : index
    %c0_111 = arith.constant 0 : index
    %c0_112 = arith.constant 0 : index
    %520 = vector.load %arg9[%c1, %c0_111, %c0_112] : memref<2x8x32xf32, #tpu.memory_space<vmem>>, vector<1x8x32xf32>
    %521 = vector.shape_cast %520 : vector<1x8x32xf32> to vector<8x32xf32>
    %522 = vector.shape_cast %516 : vector<8x32xf32> to vector<1x8x32xf32>
    tpu.vector_store %arg9[%c1, %c0_111, %c0_112], %522 {strides = array<i32>} : memref<2x8x32xf32, #tpu.memory_space<vmem>>, vector<1x8x32xf32>,
    return
  }
}

</mosaic_0001>

<bundles_post_ra>
// kernel: tpu_custom_call.1
= control target key start
LH: loop header
LB: loop body
LE: loop exit
PB: predicated region body
PF: predicated region fallthrough
CT: control target
= control target key end

     0   :  { %14 = vsyncpa [#allocation4], 0  ;;  %s2404_s0 = inlined_call_operand.hbm [shape: f32[64,512], index: 0, kind: input, shape index: {}]   ;;  %s2405_s1 = inlined_call_operand.hbm [shape: f32[512,128], index: 1, kind: input, shape index: {}]   ;;  %s2406_s2 = inlined_call_operand.vmem [shape: f32[1,128], index: 2, kind: input, shape index: {}]   ;;  %s2407_s3 = inlined_call_operand.hbm [shape: f32[32,128], index: 3, kind: input, shape index: {}]   ;;  %s2408_s4 = inlined_call_operand.vmem [shape: f32[1,32], index: 4, kind: input, shape index: {}]   ;;  %s2409_s5 = inlined_call_operand.hbm [shape: f32[32,128], index: 5, kind: input, shape index: {}]   ;;  %s2410_s6 = inlined_call_operand.vmem [shape: f32[1,128], index: 6, kind: input, shape index: {}]   ;;  %s2411_s7 = inlined_call_operand.hbm [shape: f32[32,128], index: 7, kind: input, shape index: {}]   ;;  %s2412_s8 = inlined_call_operand.vmem [shape: f32[1,32], index: 8, kind: input, shape index: {}]   ;;  %s2413_s9 = inlined_call_operand.hbm [shape: f32[2,8,32], index: 9, kind: output, shape index: {}]  }
   0x1   :  { %15 = vsyncpa [#allocation7], 0 }
   0x2   :  { %16 = vsyncpa [#allocation10], 0  ;;  %s35_s11 = sshll.u32 %s2405_s1, 4  ;;  %s36_s11 = int_to_ptr.hbm [resolvable:$true] %s35_s11 }
   0x3   :  { %17 = vsyncpa [#allocation5], 0  ;;  %s1962_s12 = smov [#allocation6]   ;;  %s65_s16 = sshll.u32 %s2409_s5, 4  ;;  %s66_s16 = int_to_ptr.hbm [resolvable:$true] %s65_s16 }
   0x4   :  { %s37_s13 = sshll.u32 %s1962_s12, 4  ;;  %s1963_s17 = smov 128   ;;  %s38_s13 = int_to_ptr.vmem [resolvable:$true] %s37_s13 }
   0x5   :  { %s1964_s18 = smov 8   ;;  %s1965_s19 = smov [#allocation9]  }
   0x6   :  { %43 = dma.hbm_to_vmem [thread:$0]  %s36_s11, 8192, %s38_s13, [#allocation7], %s1963_s17, %s1963_s17, %s1964_s18  }
   0x7   :  { %s67_s20 = sshll.u32 %s1965_s19, 4  ;;  %s22_s22 = sshll.u32 %s2404_s0, 4  ;;  %s68_s20 = int_to_ptr.vmem [resolvable:$true] %s67_s20  ;;  %s23_s22 = int_to_ptr.hbm [resolvable:$true] %s22_s22 }
   0x8   :  { %73 = dma.hbm_to_vmem [thread:$0]  %s66_s16, 512, %s68_s20, [#allocation10], %s1963_s17, %s1963_s17, %s1964_s18  }
   0x9   :  { %s1966_s5 = smov [#allocation3]   ;;  %s50_s26 = sshll.u32 %s2407_s3, 4  ;;  %s51_s26 = int_to_ptr.hbm [resolvable:$true] %s50_s26 }
   0xa   :  { %s24_s23 = sshll.u32 %s1966_s5, 4  ;;  %s1967_s27 = smov 512   ;;  %s25_s23 = int_to_ptr.vmem [resolvable:$true] %s24_s23 }
   0xb   :  { %s1968_s28 = smov 32   ;;  %s1969_s29 = smov [#allocation8]  }
   0xc   :  { %30 = dma.hbm_to_vmem [thread:$0]  %s23_s22, 4096, %s25_s23, [#allocation4], %s1967_s27, %s1967_s27, %s1968_s28  }
   0xd   :  { %s52_s30 = sshll.u32 %s1969_s29, 4  ;;  %s80_s11 = sshll.u32 %s2411_s7, 4  ;;  %s53_s30 = int_to_ptr.vmem [resolvable:$true] %s52_s30  ;;  %s81_s11 = int_to_ptr.hbm [resolvable:$true] %s80_s11 }
   0xe   :  { %58 = dma.hbm_to_vmem [thread:$0]  %s51_s26, 512, %s53_s30, [#allocation7], %s1963_s17, %s1963_s17, %s1964_s18  }
   0xf   :  { %s1970_s12 = smov [#allocation11]  }
  0x10   :  { %s82_s13 = sshll.u32 %s1970_s12, 4  ;;  %s83_s13 = int_to_ptr.vmem [resolvable:$true] %s82_s13 }
  0x11   :  { %88 = dma.hbm_to_vmem [thread:$0]  %s81_s11, 512, %s83_s13, [#allocation10], %s1963_s17, %s1963_s17, %s1964_s18  }
  0x12   :  { %1954 = dma.done.wait [#allocation4], 4096  }
  0x13   :  { %1955 = vsyncadd [#allocation4], 4294963200 }
  0x14   :  { %1956 = dma.done.wait [#allocation7], 8704  }
  0x15   :  { %1957 = vsyncadd [#allocation7], 4294958592 }
  0x16   :  { %1958 = dma.done.wait [#allocation10], 1024  }
  0x17   :  { %1959 = vsyncadd [#allocation10], 4294966272  ;;  %v158_v0 = vld [vmem:[#allocation6 + $0x78] sm:$0xff]  ;;  %v157_v2 = vld [vmem:[#allocation6 + $0x70] sm:$0xff]  ;;  %s1971_s14 = smov 64   ;;  %vm406_vm4 = vcmask 261120  }
  0x18   :  { %v190_v1 = vld [vmem:[#allocation6 + $0x178] sm:$0xff]  ;;  %211 = vmatpush.msra.mxu0 %v158_v0  ;;  %v189_v4 = vld [vmem:[#allocation6 + $0x170] sm:$0xff]  ;;  %v156_v6 = vld [vmem:[#allocation6 + $0x68] sm:$0xff]  ;;  %s1639_s24 = sshll.u32 %s2413_s9, 4  ;;  %s1640_s24 = int_to_ptr.hbm [resolvable:$true] %s1639_s24 }
  0x19   :  { %293 = vmatpush.msra.mxu2 %v190_v1  ;;  %v174_v3 = vld [vmem:[#allocation6 + $0xf8] sm:$0xff]  ;;  %v173_v7 = vld [vmem:[#allocation6 + $0xf0] sm:$0xff]  ;;  %v188_v8 = vld [vmem:[#allocation6 + $0x168] sm:$0xff] }
  0x1a   :  { %v206_v5 = vld [vmem:[#allocation6 + $0x1f8] sm:$0xff]  ;;  %252 = vmatpush.msra.mxu1 %v174_v3  ;;  %212 = vmatpush.msra.mxu0 %v157_v2  ;;  %v205_v9 = vld [vmem:[#allocation6 + $0x1f0] sm:$0xff]  ;;  %v172_v10 = vld [vmem:[#allocation6 + $0xe8] sm:$0xff] }
  0x1b   :  { %334 = vmatpush.msra.mxu3 %v206_v5  ;;  %294 = vmatpush.msra.mxu2 %v189_v4  ;;  %v155_v11 = vld [vmem:[#allocation6 + $0x60] sm:$0xff]  ;;  %v204_v13 = vld [vmem:[#allocation6 + $0x1e8] sm:$0xff]  ;;  %v154_v16 = vld [vmem:[#allocation6 + $0x58] sm:$0xff] }
  0x1c   :  { %253 = vmatpush.msra.mxu1 %v173_v7  ;;  %v187_v12 = vld [vmem:[#allocation6 + $0x160] sm:$0xff]  ;;  %213 = vmatpush.msra.mxu0 %v156_v6  ;;  %v186_v17 = vld [vmem:[#allocation6 + $0x158] sm:$0xff]  ;;  %v153_v20 = vld [vmem:[#allocation6 + $0x50] sm:$0xff] }
  0x1d   :  { %335 = vmatpush.msra.mxu3 %v205_v9  ;;  %295 = vmatpush.msra.mxu2 %v188_v8  ;;  %v171_v14 = vld [vmem:[#allocation6 + $0xe0] sm:$0xff]  ;;  %v170_v18 = vld [vmem:[#allocation6 + $0xd8] sm:$0xff]  ;;  %v185_v21 = vld [vmem:[#allocation6 + $0x150] sm:$0xff] }
  0x1e   :  { %v203_v15 = vld [vmem:[#allocation6 + $0x1e0] sm:$0xff]  ;;  %254 = vmatpush.msra.mxu1 %v172_v10  ;;  %214 = vmatpush.msra.mxu0 %v155_v11  ;;  %v202_v19 = vld [vmem:[#allocation6 + $0x1d8] sm:$0xff]  ;;  %v169_v22 = vld [vmem:[#allocation6 + $0xd0] sm:$0xff] }
  0x1f   :  { %336 = vmatpush.msra.mxu3 %v204_v13  ;;  %296 = vmatpush.msra.mxu2 %v187_v12  ;;  %v201_v23 = vld [vmem:[#allocation6 + $0x1d0] sm:$0xff]  ;;  %v152_v24 = vld [vmem:[#allocation6 + $0x48] sm:$0xff]  ;;  %v151_v28 = vld [vmem:[#allocation6 + $0x40] sm:$0xff] }
  0x20   :  { %255 = vmatpush.msra.mxu1 %v171_v14  ;;  %215 = vmatpush.msra.mxu0 %v154_v16  ;;  %v184_v25 = vld [vmem:[#allocation6 + $0x148] sm:$0xff]  ;;  %v183_v29 = vld [vmem:[#allocation6 + $0x140] sm:$0xff]  ;;  %v150_v32 = vld [vmem:[#allocation6 + $0x38] sm:$0xff] }
  0x21   :  { %337 = vmatpush.msra.mxu3 %v203_v15  ;;  %297 = vmatpush.msra.mxu2 %v186_v17  ;;  %v168_v26 = vld [vmem:[#allocation6 + $0xc8] sm:$0xff]  ;;  %v167_v30 = vld [vmem:[#allocation6 + $0xc0] sm:$0xff]  ;;  %v182_v33 = vld [vmem:[#allocation6 + $0x138] sm:$0xff] }
  0x22   :  { %256 = vmatpush.msra.mxu1 %v170_v18  ;;  %216 = vmatpush.msra.mxu0 %v153_v20  ;;  %v200_v27 = vld [vmem:[#allocation6 + $0x1c8] sm:$0xff]  ;;  %v199_v31 = vld [vmem:[#allocation6 + $0x1c0] sm:$0xff]  ;;  %v166_v34 = vld [vmem:[#allocation6 + $0xb8] sm:$0xff] }
  0x23   :  { %338 = vmatpush.msra.mxu3 %v202_v19  ;;  %298 = vmatpush.msra.mxu2 %v185_v21  ;;  %v198_v35 = vld [vmem:[#allocation6 + $0x1b8] sm:$0xff]  ;;  %v149_v36 = vld [vmem:[#allocation6 + $0x30] sm:$0xff]  ;;  %v148_v40 = vld [vmem:[#allocation6 + $0x28] sm:$0xff] }
  0x24   :  { %257 = vmatpush.msra.mxu1 %v169_v22  ;;  %217 = vmatpush.msra.mxu0 %v152_v24  ;;  %v181_v37 = vld [vmem:[#allocation6 + $0x130] sm:$0xff]  ;;  %v180_v41 = vld [vmem:[#allocation6 + $0x128] sm:$0xff]  ;;  %v147_v44 = vld [vmem:[#allocation6 + $0x20] sm:$0xff] }
  0x25   :  { %339 = vmatpush.msra.mxu3 %v201_v23  ;;  %299 = vmatpush.msra.mxu2 %v184_v25  ;;  %v165_v38 = vld [vmem:[#allocation6 + $0xb0] sm:$0xff]  ;;  %v164_v42 = vld [vmem:[#allocation6 + $0xa8] sm:$0xff]  ;;  %v179_v45 = vld [vmem:[#allocation6 + $0x120] sm:$0xff] }
  0x26   :  { %258 = vmatpush.msra.mxu1 %v168_v26  ;;  %218 = vmatpush.msra.mxu0 %v151_v28  ;;  %v197_v39 = vld [vmem:[#allocation6 + $0x1b0] sm:$0xff]  ;;  %v196_v43 = vld [vmem:[#allocation6 + $0x1a8] sm:$0xff]  ;;  %v163_v46 = vld [vmem:[#allocation6 + $0xa0] sm:$0xff] }
  0x27   :  { %340 = vmatpush.msra.mxu3 %v200_v27  ;;  %300 = vmatpush.msra.mxu2 %v183_v29  ;;  %v195_v47 = vld [vmem:[#allocation6 + $0x1a0] sm:$0xff]  ;;  %v146_v48 = vld [vmem:[#allocation6 + $0x18] sm:$0xff]  ;;  %v145_v52 = vld [vmem:[#allocation6 + $0x10] sm:$0xff] }
  0x28   :  { %259 = vmatpush.msra.mxu1 %v167_v30  ;;  %219 = vmatpush.msra.mxu0 %v150_v32  ;;  %v178_v49 = vld [vmem:[#allocation6 + $0x118] sm:$0xff]  ;;  %v177_v53 = vld [vmem:[#allocation6 + $0x110] sm:$0xff]  ;;  %v144_v54 = vld [vmem:[#allocation6 + $0x8] sm:$0xff] }
  0x29   :  { %341 = vmatpush.msra.mxu3 %v199_v31  ;;  %301 = vmatpush.msra.mxu2 %v182_v33  ;;  %v162_v50 = vld [vmem:[#allocation6 + $0x98] sm:$0xff]  ;;  %v161_v55 = vld [vmem:[#allocation6 + $0x90] sm:$0xff]  ;;  %v176_v57 = vld [vmem:[#allocation6 + $0x108] sm:$0xff] }
  0x2a   :  { %260 = vmatpush.msra.mxu1 %v166_v34  ;;  %220 = vmatpush.msra.mxu0 %v149_v36  ;;  %v194_v51 = vld [vmem:[#allocation6 + $0x198] sm:$0xff]  ;;  %v193_v56 = vld [vmem:[#allocation6 + $0x190] sm:$0xff]  ;;  %v143_v58 = vld [vmem:[#allocation6] sm:$0xff] }
  0x2b   :  { %342 = vmatpush.msra.mxu3 %v198_v35  ;;  %302 = vmatpush.msra.mxu2 %v181_v37  ;;  %v160_v59 = vld [vmem:[#allocation6 + $0x88] sm:$0xff]  ;;  %v175_v60 = vld [vmem:[#allocation6 + $0x100] sm:$0xff]  ;;  %v113_v63 = vld [vmem:[#allocation3 + $0x10] sm:$0xff]  ;;  %v1972_v37 = vmov 0.0  }
  0x2c   :  { %261 = vmatpush.msra.mxu1 %v165_v38  ;;  %221 = vmatpush.msra.mxu0 %v148_v40  ;;  %v192_v61 = vld [vmem:[#allocation6 + $0x188] sm:$0xff]  ;;  %v111_v62 = vld [vmem:[#allocation3] sm:$0xff]  ;;  %v2052_v0 = vld [vmem:[#allocation8 + $0x18] sm:$0xff] }
  0x2d   :  { %343 = vmatpush.msra.mxu3 %v197_v39  ;;  %303 = vmatpush.msra.mxu2 %v180_v41  ;;  %v159_v1 = vld [vmem:[#allocation6 + $0x80] sm:$0xff]  ;;  %v112_v3 = vld [vmem:[#allocation3 + $0x8] sm:$0xff]  ;;  %v114_v4 = vld [vmem:[#allocation3 + $0x18] sm:$0xff] }
  0x2e   :  { %262 = vmatpush.msra.mxu1 %v164_v42  ;;  %222 = vmatpush.msra.mxu0 %v147_v44  ;;  %v191_v2 = vld [vmem:[#allocation6 + $0x180] sm:$0xff]  ;;  %v2054_v5 = vld [vmem:[#allocation8 + $0x10] sm:$0xff]  ;;  %v2057_v6 = vld [vmem:[#allocation8 + $0x8] sm:$0xff] }
  0x2f   :  { %344 = vmatpush.msra.mxu3 %v196_v43  ;;  %304 = vmatpush.msra.mxu2 %v179_v45  ;;  %v115_v7 = vld [vmem:[#allocation3 + $0x20] sm:$0xff]  ;;  %v117_v8 = vld [vmem:[#allocation3 + $0x30] sm:$0xff]  ;;  %v116_v9 = vld [vmem:[#allocation3 + $0x28] sm:$0xff] }
  0x30   :  { %263 = vmatpush.msra.mxu1 %v163_v46  ;;  %223 = vmatpush.msra.mxu0 %v146_v48  ;;  %v118_v10 = vld [vmem:[#allocation3 + $0x38] sm:$0xff]  ;;  %v119_v11 = vld [vmem:[#allocation3 + $0x40] sm:$0xff]  ;;  %v121_v12 = vld [vmem:[#allocation3 + $0x50] sm:$0xff] }
  0x31   :  { %345 = vmatpush.msra.mxu3 %v195_v47  ;;  %305 = vmatpush.msra.mxu2 %v178_v49  ;;  %v120_v13 = vld [vmem:[#allocation3 + $0x48] sm:$0xff]  ;;  %v122_v14 = vld [vmem:[#allocation3 + $0x58] sm:$0xff]  ;;  %v2064_v15 = vld [vmem:[#allocation8] sm:$0xff] }
  0x32   :  { %264 = vmatpush.msra.mxu1 %v162_v50  ;;  %224 = vmatpush.msra.mxu0 %v145_v52  ;;  %v123_v16 = vld [vmem:[#allocation3 + $0x60] sm:$0xff]  ;;  %v125_v17 = vld [vmem:[#allocation3 + $0x70] sm:$0xff]  ;;  %v124_v18 = vld [vmem:[#allocation3 + $0x68] sm:$0xff] }
  0x33   :  { %346 = vmatpush.msra.mxu3 %v194_v51  ;;  %306 = vmatpush.msra.mxu2 %v177_v53  ;;  %v126_v19 = vld [vmem:[#allocation3 + $0x78] sm:$0xff]  ;;  %v127_v20 = vld [vmem:[#allocation3 + $0x80] sm:$0xff]  ;;  %v129_v21 = vld [vmem:[#allocation3 + $0x90] sm:$0xff] }
  0x34   :  { %265 = vmatpush.msra.mxu1 %v161_v55  ;;  %225 = vmatpush.msra.mxu0 %v144_v54  ;;  %v128_v22 = vld [vmem:[#allocation3 + $0x88] sm:$0xff]  ;;  %v130_v23 = vld [vmem:[#allocation3 + $0x98] sm:$0xff]  ;;  %v1705_v24 = vld [vmem:[%s2408_s4] ss:$0 sm:$0xff] }
  0x35   :  { %347 = vmatpush.msra.mxu3 %v193_v56  ;;  %307 = vmatpush.msra.mxu2 %v176_v57  ;;  %v131_v25 = vld [vmem:[#allocation3 + $0xa0] sm:$0xff]  ;;  %v133_v26 = vld [vmem:[#allocation3 + $0xb0] sm:$0xff]  ;;  %v132_v27 = vld [vmem:[#allocation3 + $0xa8] sm:$0xff] }
  0x36   :  { %266 = vmatpush.msra.mxu1 %v160_v59  ;;  %226 = vmatpush.msra.mxu0 %v143_v58  ;;  %v134_v28 = vld [vmem:[#allocation3 + $0xb8] sm:$0xff]  ;;  %v135_v29 = vld [vmem:[#allocation3 + $0xc0] sm:$0xff]  ;;  %v137_v30 = vld [vmem:[#allocation3 + $0xd0] sm:$0xff] }
  0x37   :  { %348 = vmatpush.msra.mxu3 %v192_v61  ;;  %308 = vmatpush.msra.mxu2 %v175_v60  ;;  %v136_v31 = vld [vmem:[#allocation3 + $0xc8] sm:$0xff]  ;;  %v138_v32 = vld [vmem:[#allocation3 + $0xd8] sm:$0xff]  ;;  %v139_v33 = vld [vmem:[#allocation3 + $0xe0] sm:$0xff] }
  0x38   :  { %227 = vmatmul.f32.vlgmr.msra.gmra.mxu0 %v111_v62  ;;  %309 = vmatmul.f32.vlgmr.msra.gmra.mxu2 %v113_v63  ;;  %v141_v34 = vld [vmem:[#allocation3 + $0xf0] sm:$0xff]  ;;  %v140_v35 = vld [vmem:[#allocation3 + $0xe8] sm:$0xff]  ;;  %v142_v36 = vld [vmem:[#allocation3 + $0xf8] sm:$0xff] }
  0x39   :  { %422 = vmatpush.msrb.mxu0 %v2052_v0  ;;  %267 = vmatpush.msra.mxu1 %v159_v1  ;;  %v1706_v41 = vld [vmem:[%s2406_s2] ss:$0 sm:$0xff]  ;;  %s1973_s2 = smov 96  }
  0x3a   :  { %349 = vmatpush.msra.mxu3 %v191_v2  ;;  %268 = vmatmul.f32.vlgmr.msra.gmra.mxu1 %v112_v3 }
  0x3b   :  { %350 = vmatmul.f32.vlgmr.msra.gmra.mxu3 %v114_v4  ;;  %423 = vmatpush.msrb.mxu0 %v2054_v5 }
  0x3c   :  { %575 = vmatpush.msrb.mxu3 %v2052_v0  ;;  %450 = vrot.lane.b32.xlu0 %v1705_v24, %s1971_s14 }
  0x3d   :  { %424 = vmatpush.msrb.mxu0 %v2057_v6 }
  0x3e   :  { %576 = vmatpush.msrb.mxu3 %v2054_v5 }
  0x3f   :  { %425 = vmatpush.msrb.mxu0 %v2064_v15 }
  0x40   :  { %230 = vmatmul.f32.gmra.mxu0 %v115_v7  ;;  %312 = vmatmul.f32.gmra.mxu2 %v117_v8 }
  0x41   :  { %577 = vmatpush.msrb.mxu3 %v2057_v6 }
  0x42   :  { %271 = vmatmul.f32.gmra.mxu1 %v116_v9 }
  0x43   :  { %353 = vmatmul.f32.gmra.mxu3 %v118_v10 }
  0x44   :  { %578 = vmatpush.msrb.mxu3 %v2064_v15 }
  0x48   :  { %233 = vmatmul.f32.gmra.mxu0 %v119_v11  ;;  %315 = vmatmul.f32.gmra.mxu2 %v121_v12 }
  0x4a   :  { %274 = vmatmul.f32.gmra.mxu1 %v120_v13 }
  0x4b   :  { %356 = vmatmul.f32.gmra.mxu3 %v122_v14 }
  0x50   :  { %236 = vmatmul.f32.gmra.mxu0 %v123_v16  ;;  %318 = vmatmul.f32.gmra.mxu2 %v125_v17 }
  0x52   :  { %277 = vmatmul.f32.gmra.mxu1 %v124_v18 }
  0x53   :  { %359 = vmatmul.f32.gmra.mxu3 %v126_v19 }
  0x58   :  { %239 = vmatmul.f32.gmra.mxu0 %v127_v20  ;;  %321 = vmatmul.f32.gmra.mxu2 %v129_v21 }
  0x5a   :  { %280 = vmatmul.f32.gmra.mxu1 %v128_v22 }
  0x5b   :  { %362 = vmatmul.f32.gmra.mxu3 %v130_v23 }
  0x60   :  { %242 = vmatmul.f32.gmra.mxu0 %v131_v25  ;;  %324 = vmatmul.f32.gmra.mxu2 %v133_v26 }
  0x62   :  { %283 = vmatmul.f32.gmra.mxu1 %v132_v27 }
  0x63   :  { %365 = vmatmul.f32.gmra.mxu3 %v134_v28 }
  0x68   :  { %245 = vmatmul.f32.gmra.mxu0 %v135_v29  ;;  %327 = vmatmul.f32.gmra.mxu2 %v137_v30 }
  0x6a   :  { %286 = vmatmul.f32.gmra.mxu1 %v136_v31 }
  0x6b   :  { %368 = vmatmul.f32.gmra.mxu3 %v138_v32 }
  0x70   :  { %248 = vmatmul.f32.gmra.mxu0 %v139_v33  ;;  %330 = vmatmul.f32.gmra.mxu2 %v141_v34 }
  0x72   :  { %289 = vmatmul.f32.gmra.mxu1 %v140_v35 }
  0x73   :  { %371 = vmatmul.f32.gmra.mxu3 %v142_v36 }
  0x78   :  { %426 = vmatmul.f32.vlgmr.msrb.gmra.mxu0 %v1972_v37 }
  0xae   :  { %v2090_v33 = vpop.permute.xlu0 %450 }
  0xb5   :  { %v228_v38 = vpop.f32.mrf.mxu0 }
  0xb6   :  { %v229_v36 = vadd.f32 %v1706_v41, %v228_v38 }
  0xb7   :  { %v269_v39 = vpop.f32.mrf.mxu1 }
  0xbb   :  { %v310_v40 = vpop.f32.mrf.mxu2 }
  0xbd   :  { %v231_v42 = vpop.f32.mrf.mxu0 }
  0xbe   :  { %v232_v43 = vadd.f32 %v1706_v41, %v231_v42  ;;  %v351_v44 = vpop.f32.mrf.mxu3  ;;  %v270_v42 = vadd.f32 %v269_v39, %v229_v36 }
  0xbf   :  { %v272_v45 = vpop.f32.mrf.mxu1 }
  0xc0   :  { %v273_v46 = vadd.f32 %v272_v45, %v232_v43  ;;  %v311_v43 = vadd.f32 %v310_v40, %v270_v42 }
  0xc2   :  { %v352_v45 = vadd.f32 %v351_v44, %v311_v43 }
  0xc3   :  { %v313_v47 = vpop.f32.mrf.mxu2 }
  0xc4   :  { %v314_v48 = vadd.f32 %v313_v47, %v273_v46 }
  0xc5   :  { %v234_v49 = vpop.f32.mrf.mxu0 }
  0xc6   :  { %v235_v50 = vadd.f32 %v1706_v41, %v234_v49  ;;  %v354_v51 = vpop.f32.mrf.mxu3 }
  0xc7   :  { %v2076_v52 = vadd.f32 %v354_v51, %v314_v48  ;;  %v275_v53 = vpop.f32.mrf.mxu1 }
  0xc8   :  { %v276_v54 = vadd.f32 %v275_v53, %v235_v50 }
  0xcb   :  { %v316_v55 = vpop.f32.mrf.mxu2 }
  0xcc   :  { %v317_v56 = vadd.f32 %v316_v55, %v276_v54 }
  0xcd   :  { %v237_v57 = vpop.f32.mrf.mxu0 }
  0xce   :  { %v238_v58 = vadd.f32 %v1706_v41, %v237_v57  ;;  %v357_v59 = vpop.f32.mrf.mxu3 }
  0xcf   :  { %v2078_v60 = vadd.f32 %v357_v59, %v317_v56  ;;  %v278_v61 = vpop.f32.mrf.mxu1  ;;  %v2097_v59 = vld [vmem:[#allocation11 + $0x10] sm:$0xff] }
  0xd0   :  { %v279_v62 = vadd.f32 %v278_v61, %v238_v58  ;;  %v2095_v58 = vld [vmem:[#allocation11 + $0x18] sm:$0xff] }
  0xd1   :  { %510 = vmatpush.msrb.mxu2 %v2095_v58 }
  0xd3   :  { %v319_v63 = vpop.f32.mrf.mxu2  ;;  %511 = vmatpush.msrb.mxu2 %v2097_v59 }
  0xd4   :  { %v320_v1 = vadd.f32 %v319_v63, %v279_v62 }
  0xd5   :  { %v240_v2 = vpop.f32.mrf.mxu0 }
  0xd6   :  { %v241_v3 = vadd.f32 %v1706_v41, %v240_v2  ;;  %v360_v4 = vpop.f32.mrf.mxu3  ;;  %v2104_v2 = vld [vmem:[#allocation11] sm:$0xff] }
  0xd7   :  { %v2080_v7 = vadd.f32 %v360_v4, %v320_v1  ;;  %v281_v8 = vpop.f32.mrf.mxu1  ;;  %v2102_v1 = vld [vmem:[#allocation11 + $0x8] sm:$0xff]  ;;  %v2115_v4 = vld [vmem:[#allocation9 + $0x10] sm:$0xff] }
  0xd8   :  { %v282_v9 = vadd.f32 %v281_v8, %v241_v3  ;;  %512 = vmatpush.msrb.mxu2 %v2102_v1  ;;  %v2113_v3 = vld [vmem:[#allocation9 + $0x18] sm:$0xff]  ;;  %v2119_v8 = vld [vmem:[#allocation9 + $0x8] sm:$0xff] }
  0xd9   :  { %490 = vmatpush.msrb.mxu1 %v2113_v3  ;;  %640 = vmatpush.msra.mxu0 %v2113_v3 }
  0xda   :  { %513 = vmatpush.msrb.mxu2 %v2104_v2  ;;  %792 = vmatpush.msra.mxu3 %v2113_v3 }
  0xdb   :  { %v322_v10 = vpop.f32.mrf.mxu2  ;;  %514 = vmatmul.f32.vlgmr.msrb.gmra.mxu2 %v1972_v37  ;;  %491 = vmatpush.msrb.mxu1 %v2115_v4  ;;  %v2125_v37 = vld [vmem:[#allocation9] sm:$0xff] }
  0xdc   :  { %v323_v11 = vadd.f32 %v322_v10, %v282_v9  ;;  %727 = vmatpush.msra.mxu2 %v2052_v0  ;;  %641 = vmatpush.msra.mxu0 %v2115_v4 }
  0xdd   :  { %v243_v12 = vpop.f32.mrf.mxu0  ;;  %793 = vmatpush.msra.mxu3 %v2115_v4  ;;  %492 = vmatpush.msrb.mxu1 %v2119_v8 }
  0xde   :  { %v244_v13 = vadd.f32 %v1706_v41, %v243_v12  ;;  %v363_v14 = vpop.f32.mrf.mxu3  ;;  %728 = vmatpush.msra.mxu2 %v2054_v5  ;;  %642 = vmatpush.msra.mxu0 %v2119_v8 }
  0xdf   :  { %v2082_v16 = vadd.f32 %v363_v14, %v323_v11  ;;  %v284_v17 = vpop.f32.mrf.mxu1  ;;  %794 = vmatpush.msra.mxu3 %v2119_v8  ;;  %493 = vmatpush.msrb.mxu1 %v2125_v37  ;;  %v1707_v14 = vld [vmem:[%s2412_s8] ss:$0 sm:$0xff] }
  0xe0   :  { %v285_v18 = vadd.f32 %v284_v17, %v244_v13  ;;  %729 = vmatpush.msra.mxu2 %v2057_v6  ;;  %643 = vmatpush.msra.mxu0 %v2125_v37 }
  0xe1   :  { %665 = vmatpush.msra.mxu1 %v2095_v58  ;;  %795 = vmatpush.msra.mxu3 %v2125_v37 }
  0xe2   :  { %730 = vmatpush.msra.mxu2 %v2064_v15  ;;  %817 = vmatpush.msrb.mxu0 %v2095_v58 }
  0xe3   :  { %v325_v19 = vpop.f32.mrf.mxu2  ;;  %666 = vmatpush.msra.mxu1 %v2097_v59 }
  0xe4   :  { %v326_v20 = vadd.f32 %v325_v19, %v285_v18  ;;  %944 = vmatpush.msrb.mxu2 %v2113_v3  ;;  %818 = vmatpush.msrb.mxu0 %v2097_v59 }
  0xe5   :  { %v246_v21 = vpop.f32.mrf.mxu0  ;;  %667 = vmatpush.msra.mxu1 %v2102_v1 }
  0xe6   :  { %v247_v22 = vadd.f32 %v1706_v41, %v246_v21  ;;  %v366_v23 = vpop.f32.mrf.mxu3  ;;  %945 = vmatpush.msrb.mxu2 %v2115_v4  ;;  %819 = vmatpush.msrb.mxu0 %v2102_v1 }
  0xe7   :  { %v2084_v24 = vadd.f32 %v366_v23, %v326_v20  ;;  %v287_v25 = vpop.f32.mrf.mxu1  ;;  %668 = vmatpush.msra.mxu1 %v2104_v2  ;;  %v2174_v23 = vld [vmem:[%s2410_s6] ss:$0 sm:$0xff] }
  0xe8   :  { %v288_v26 = vadd.f32 %v287_v25, %v247_v22  ;;  %946 = vmatpush.msrb.mxu2 %v2119_v8  ;;  %820 = vmatpush.msrb.mxu0 %v2104_v2 }
  0xea   :  { %947 = vmatpush.msrb.mxu2 %v2125_v37 }
  0xeb   :  { %v328_v27 = vpop.f32.mrf.mxu2 }
  0xec   :  { %v329_v28 = vadd.f32 %v328_v27, %v288_v26 }
  0xed   :  { %v249_v29 = vpop.f32.mrf.mxu0 }
  0xee   :  { %v2086_v30 = vadd.f32 %v1706_v41, %v249_v29  ;;  %v369_v31 = vpop.f32.mrf.mxu3 }
  0xef   :  { %v2088_v32 = vadd.f32 %v369_v31, %v329_v28  ;;  %v2169_v22 = vpop.f32.mrf.mxu1 }
  0xf3   :  { %v2153_v18 = vpop.f32.mrf.mxu2 }
  0xf5   :  { %v427_v34 = vpop.f32.mrf.mxu0 }
  0xf6   :  { %v453_v35 = vadd.f32 %v2090_v33, %v427_v34  ;;  %v430_v46 = vadd.f32 %v427_v34, %v352_v45  ;;  %v2176_v25 = vpop.f32.mrf.mxu3 }
  0xf8   :  { %455 = vrot.lane.b32.xlu0 %v453_v35, %s1971_s14  ;;  %v1654_v47 = vmul.f32 -1.442695, %v430_v46 }
  0xfa   :  { %1709 = vpow2.f32 %v1654_v47 }
 0x100   :  { %v1710_v48 = vpop.eup %1709 }
 0x101   :  { %v434_v49 = vadd.f32 1.0, %v1710_v48 }
 0x103   :  { %1711 = vrcp.f32 %v434_v49  ;;  %v446_v56 = vand.u32 2147483648, %v434_v49  ;;  %vm440_vm1 = vweird.f32 %v434_v49  ;;  %v444_v57 = vand.u32 2147483647, %v434_v49 }
 0x105   :  { %v447_v39 = vor.u32 1.1754944e-38, %v446_v56  ;;  %vm445_vm3 = vcmp.eq.f32.partialorder %v444_v57, 8.507059e+37 }
 0x109   :  { %v1712_v50 = vpop.eup %1711 }
 0x10a   :  { %v436_v51 = vmul.f32 %v1712_v50, %v434_v49  ;;  %vm441_vm0 = vweird.f32 %v1712_v50 }
 0x10b   :  { %vm442_vm2 = vmor %vm440_vm1, %vm441_vm0 }
 0x10c   :  { %v437_v53 = vsub.f32 1.0, %v436_v51 }
 0x10e   :  { %v438_v54 = vmul.f32 %v1712_v50, %v437_v53 }
 0x110   :  { %v439_v55 = vadd.f32 %v1712_v50, %v438_v54 }
 0x112   :  { %v443_v38 = vsel %vm442_vm2, %v1712_v50, %v439_v55 }
 0x113   :  { %v448_v41 = vsel %vm445_vm3, %v447_v39, %v443_v38 }
 0x114   :  { %v465_v9 = vsub.f32 1.0, %v448_v41  ;;  %v471_v12 = vmul.f32 0.0, %v448_v41 }
 0x15e   :  { %v515_v20 = vpop.f32.mrf.mxu2 }
 0x16a   :  { %v456_v40 = vpop.permute.xlu0 %455 }
 0x16b   :  { %v458_v44 = vmul.f32 %v456_v40, %v448_v41 }
 0x16d   :  { %460 = vrot.lane.b32.xlu1 %v458_v44, %s1971_s14 }
 0x1df   :  { %v461_v61 = vpop.permute.xlu1 %460 }
 0x1e0   :  { %v463_v62 = vadd.f32 %v461_v61, %v352_v45 }
 0x1e2   :  { %1713 = vtanh.f32 %v463_v62 }
 0x1e8   :  { %v1714_v63 = vpop.eup %1713 }
 0x1e9   :  { %467 = vrot.lane.b32.xlu1 %v1714_v63, %s1973_s2 }
 0x25b   :  { %v468_v10 = vpop.permute.xlu1 %467 }
 0x25c   :  { %v470_v11 = vmul.f32 %v468_v10, %v465_v9 }
 0x25e   :  { %v2145_v13 = vadd.f32 %v471_v12, %v470_v11 }
 0x260   :  { %474 = vrot.lane.b32.xlu2 %v2145_v13, %s1973_s2 }
 0x268   :  { %538 = vrot.lane.b32.xlu2 %v1707_v14, %s1971_s14 }
 0x2ba   :  { %v475_v17 = vpop.permute.xlu2 %474 }
 0x2bb   :  { %1655 = vmatmul.msk.f32.vlgmr.msrb.gmra.mxu1 %vm406_vm4, %v475_v17  ;;  %1657 = vmatmul.msk.f32.vlgmr.msrb.gmra.mxu3 %vm406_vm4, %v475_v17 }
 0x2bc   :  { %879 = vmatpush.msrb.mxu1 %v2052_v0  ;;  %969 = vmatpush.msrb.mxu3 %v2095_v58 }
 0x2be   :  { %880 = vmatpush.msrb.mxu1 %v2054_v5  ;;  %970 = vmatpush.msrb.mxu3 %v2097_v59 }
 0x2c0   :  { %881 = vmatpush.msrb.mxu1 %v2057_v6  ;;  %971 = vmatpush.msrb.mxu3 %v2102_v1 }
 0x2c2   :  { %v2163_v19 = vpop.permute.xlu2 %538  ;;  %882 = vmatpush.msrb.mxu1 %v2064_v15  ;;  %972 = vmatpush.msrb.mxu3 %v2104_v2 }
 0x2c3   :  { %v541_v21 = vadd.f32 %v2163_v19, %v515_v20 }
 0x2c5   :  { %543 = vrot.lane.b32.xlu1 %v541_v21, %s1971_s14 }
 0x337   :  { %v544_v51 = vpop.permute.xlu1 %543 }
 0x338   :  { %v495_v26 = vpop.f32.mrf.mxu1 }
 0x339   :  { %v496_v27 = vadd.f32 %v2174_v23, %v495_v26 }
 0x33b   :  { %v518_v28 = vadd.f32 %v515_v20, %v496_v27 }
 0x33d   :  { %v1656_v29 = vmul.f32 -1.442695, %v518_v28 }
 0x33e   :  { %v580_v31 = vpop.f32.mrf.mxu3 }
 0x33f   :  { %1715 = vpow2.f32 %v1656_v29  ;;  %v603_v34 = vadd.f32 %v580_v31, %v2090_v33  ;;  %v583_v56 = vadd.f32 %v580_v31, %v2076_v52 }
 0x341   :  { %605 = vrot.lane.b32.xlu0 %v603_v34, %s1971_s14  ;;  %v1658_v57 = vmul.f32 -1.442695, %v583_v56 }
 0x345   :  { %v1716_v35 = vpop.eup %1715 }
 0x346   :  { %v522_v36 = vadd.f32 1.0, %v1716_v35 }
 0x348   :  { %1717 = vrcp.f32 %v522_v36  ;;  %v534_v46 = vand.u32 2147483648, %v522_v36  ;;  %v532_v48 = vand.u32 2147483647, %v522_v36  ;;  %vm528_vm6 = vweird.f32 %v522_v36 }
 0x349   :  { %1719 = vpow2.f32 %v1658_v57 }
 0x34a   :  { %v535_v50 = vor.u32 1.1754944e-38, %v534_v46  ;;  %vm533_vm8 = vcmp.eq.f32.partialorder %v532_v48, 8.507059e+37 }
 0x34e   :  { %v1718_v42 = vpop.eup %1717 }
 0x34f   :  { %v524_v43 = vmul.f32 %v1718_v42, %v522_v36  ;;  %vm529_vm5 = vweird.f32 %v1718_v42  ;;  %v1720_v38 = vpop.eup %1719 }
 0x350   :  { %vm530_vm7 = vmor %vm528_vm6, %vm529_vm5  ;;  %v587_v39 = vadd.f32 1.0, %v1720_v38 }
 0x351   :  { %v525_v45 = vsub.f32 1.0, %v524_v43 }
 0x352   :  { %1721 = vrcp.f32 %v587_v39  ;;  %v599_v63 = vand.u32 2147483648, %v587_v39  ;;  %vm593_vm10 = vweird.f32 %v587_v39  ;;  %v597_v9 = vand.u32 2147483647, %v587_v39 }
 0x353   :  { %v526_v47 = vmul.f32 %v1718_v42, %v525_v45 }
 0x354   :  { %v600_v11 = vor.u32 1.1754944e-38, %v599_v63  ;;  %vm598_vm12 = vcmp.eq.f32.partialorder %v597_v9, 8.507059e+37 }
 0x355   :  { %v527_v49 = vadd.f32 %v1718_v42, %v526_v47 }
 0x357   :  { %v531_v53 = vsel %vm530_vm7, %v1718_v42, %v527_v49 }
 0x358   :  { %v536_v54 = vsel %vm533_vm8, %v535_v50, %v531_v53  ;;  %v1722_v40 = vpop.eup %1721 }
 0x359   :  { %v546_v55 = vmul.f32 %v544_v51, %v536_v54  ;;  %v589_v41 = vmul.f32 %v1722_v40, %v587_v39  ;;  %vm594_vm9 = vweird.f32 %v1722_v40  ;;  %v553_v34 = vsub.f32 1.0, %v536_v54 }
 0x35a   :  { %vm595_vm11 = vmor %vm593_vm10, %vm594_vm9  ;;  %v559_v36 = vmul.f32 0.0, %v536_v54 }
 0x35b   :  { %548 = vrot.lane.b32.xlu0 %v546_v55, %s1971_s14  ;;  %v590_v44 = vsub.f32 1.0, %v589_v41 }
 0x35d   :  { %v591_v61 = vmul.f32 %v1722_v40, %v590_v44 }
 0x35f   :  { %v592_v62 = vadd.f32 %v1722_v40, %v591_v61 }
 0x361   :  { %v596_v10 = vsel %vm595_vm11, %v1722_v40, %v592_v62 }
 0x362   :  { %v601_v14 = vsel %vm598_vm12, %v600_v11, %v596_v10 }
 0x363   :  { %v621_v46 = vmul.f32 %v601_v14, %v2145_v13 }
 0x3b3   :  { %v606_v12 = vpop.permute.xlu0 %605 }
 0x3b4   :  { %v608_v17 = vmul.f32 %v606_v12, %v601_v14 }
 0x3b6   :  { %610 = vrot.lane.b32.xlu2 %v608_v17, %s1971_s14 }
 0x3cd   :  { %v549_v20 = vpop.permute.xlu0 %548 }
 0x3ce   :  { %v551_v21 = vadd.f32 %v549_v20, %v496_v27  ;;  %v615_v27 = vsub.f32 1.0, %v601_v14 }
 0x3d0   :  { %1723 = vtanh.f32 %v551_v21 }
 0x3d6   :  { %v1724_v26 = vpop.eup %1723 }
 0x3d7   :  { %555 = vrot.lane.b32.xlu2 %v1724_v26, %s1973_s2 }
 0x410   :  { %v611_v28 = vpop.permute.xlu2 %610 }
 0x411   :  { %v613_v29 = vadd.f32 %v611_v28, %v2076_v52 }
 0x413   :  { %1725 = vtanh.f32 %v613_v29 }
 0x419   :  { %v1726_v31 = vpop.eup %1725 }
 0x41a   :  { %617 = vrot.lane.b32.xlu1 %v1726_v31, %s1973_s2 }
 0x431   :  { %v556_v35 = vpop.permute.xlu2 %555 }
 0x432   :  { %v558_v42 = vmul.f32 %v556_v35, %v553_v34 }
 0x434   :  { %v2187_v43 = vadd.f32 %v559_v36, %v558_v42 }
 0x436   :  { %649 = vrot.lane.b32.xlu1 %v2187_v43, %s1973_s2 }
 0x48c   :  { %v618_v45 = vpop.permute.xlu1 %617 }
 0x48d   :  { %v620_v47 = vmul.f32 %v618_v45, %v615_v27 }
 0x48f   :  { %v2192_v48 = vadd.f32 %v621_v46, %v620_v47 }
 0x491   :  { %624 = vrot.lane.b32.xlu0 %v2192_v48, %s1973_s2 }
 0x4a8   :  { %v650_v52 = vpop.permute.xlu1 %649 }
 0x4a9   :  { %1660 = vmatmul.msk.f32.vlgmr.msra.gmra.mxu1 %vm406_vm4, %v650_v52 }
 0x4aa   :  { %1096 = vmatpush.msra.mxu1 %v2113_v3 }
 0x4ac   :  { %1097 = vmatpush.msra.mxu1 %v2115_v4 }
 0x4ae   :  { %1098 = vmatpush.msra.mxu1 %v2119_v8 }
 0x4b0   :  { %1099 = vmatpush.msra.mxu1 %v2125_v37 }
 0x503   :  { %v625_v49 = vpop.permute.xlu0 %624 }
 0x504   :  { %1659 = vmatmul.msk.f32.vlgmr.msra.gmra.mxu0 %vm406_vm4, %v625_v49  ;;  %1662 = vmatmul.msk.f32.vlgmr.msra.gmra.mxu2 %vm406_vm4, %v625_v49 }
 0x505   :  { %1031 = vmatpush.msra.mxu0 %v2052_v0  ;;  %1121 = vmatpush.msra.mxu2 %v2095_v58 }
 0x507   :  { %1032 = vmatpush.msra.mxu0 %v2054_v5  ;;  %1122 = vmatpush.msra.mxu2 %v2097_v59 }
 0x509   :  { %1033 = vmatpush.msra.mxu0 %v2057_v6  ;;  %1123 = vmatpush.msra.mxu2 %v2102_v1 }
 0x50b   :  { %1034 = vmatpush.msra.mxu0 %v2064_v15  ;;  %1124 = vmatpush.msra.mxu2 %v2104_v2 }
 0x526   :  { %v670_v13 = vpop.f32.mrf.mxu1 }
 0x527   :  { %v693_v50 = vadd.f32 %v670_v13, %v2163_v19 }
 0x529   :  { %695 = vrot.lane.b32.xlu2 %v693_v50, %s1971_s14 }
 0x581   :  { %v645_v51 = vpop.f32.mrf.mxu0 }
 0x582   :  { %v646_v53 = vadd.f32 %v2174_v23, %v645_v51 }
 0x583   :  { %v696_v12 = vpop.permute.xlu2 %695 }
 0x584   :  { %v673_v54 = vadd.f32 %v670_v13, %v646_v53 }
 0x586   :  { %v1661_v55 = vmul.f32 -1.442695, %v673_v54 }
 0x587   :  { %v732_v56 = vpop.f32.mrf.mxu2 }
 0x588   :  { %1727 = vpow2.f32 %v1661_v55  ;;  %v755_v57 = vadd.f32 %v732_v56, %v2090_v33  ;;  %v735_v20 = vadd.f32 %v732_v56, %v2078_v60 }
 0x58a   :  { %757 = vrot.lane.b32.xlu0 %v755_v57, %s1971_s14  ;;  %v1663_v21 = vmul.f32 -1.442695, %v735_v20 }
 0x58e   :  { %v1728_v38 = vpop.eup %1727 }
 0x58f   :  { %v677_v39 = vadd.f32 1.0, %v1728_v38 }
 0x591   :  { %1729 = vrcp.f32 %v677_v39  ;;  %v689_v61 = vand.u32 2147483648, %v677_v39  ;;  %v687_v63 = vand.u32 2147483647, %v677_v39  ;;  %vm683_vm14 = vweird.f32 %v677_v39 }
 0x592   :  { %1731 = vpow2.f32 %v1663_v21 }
 0x593   :  { %v690_v10 = vor.u32 1.1754944e-38, %v689_v61  ;;  %vm688_vm0 = vcmp.eq.f32.partialorder %v687_v63, 8.507059e+37 }
 0x597   :  { %v1730_v40 = vpop.eup %1729 }
 0x598   :  { %v679_v41 = vmul.f32 %v1730_v40, %v677_v39  ;;  %vm684_vm13 = vweird.f32 %v1730_v40  ;;  %v1732_v26 = vpop.eup %1731 }
 0x599   :  { %vm685_vm15 = vmor %vm683_vm14, %vm684_vm13  ;;  %v739_v28 = vadd.f32 1.0, %v1732_v26 }
 0x59a   :  { %v680_v44 = vsub.f32 1.0, %v679_v41 }
 0x59b   :  { %1733 = vrcp.f32 %v739_v28  ;;  %v751_v42 = vand.u32 2147483648, %v739_v28  ;;  %vm745_vm2 = vweird.f32 %v739_v28  ;;  %v749_v27 = vand.u32 2147483647, %v739_v28 }
 0x59c   :  { %v681_v62 = vmul.f32 %v1730_v40, %v680_v44 }
 0x59d   :  { %v752_v46 = vor.u32 1.1754944e-38, %v751_v42  ;;  %vm750_vm5 = vcmp.eq.f32.partialorder %v749_v27, 8.507059e+37 }
 0x59e   :  { %v682_v9 = vadd.f32 %v1730_v40, %v681_v62 }
 0x5a0   :  { %v686_v11 = vsel %vm685_vm15, %v1730_v40, %v682_v9 }
 0x5a1   :  { %v691_v14 = vsel %vm688_vm0, %v690_v10, %v686_v11  ;;  %v1734_v29 = vpop.eup %1733 }
 0x5a2   :  { %v698_v17 = vmul.f32 %v696_v12, %v691_v14  ;;  %v741_v31 = vmul.f32 %v1734_v29, %v739_v28  ;;  %vm746_vm1 = vweird.f32 %v1734_v29  ;;  %v705_v57 = vsub.f32 1.0, %v691_v14 }
 0x5a3   :  { %vm747_vm3 = vmor %vm745_vm2, %vm746_vm1  ;;  %v711_v39 = vmul.f32 %v691_v14, %v2187_v43 }
 0x5a4   :  { %700 = vrot.lane.b32.xlu1 %v698_v17, %s1971_s14  ;;  %v742_v34 = vsub.f32 1.0, %v741_v31 }
 0x5a6   :  { %v743_v35 = vmul.f32 %v1734_v29, %v742_v34 }
 0x5a8   :  { %v744_v36 = vadd.f32 %v1734_v29, %v743_v35 }
 0x5aa   :  { %v748_v45 = vsel %vm747_vm3, %v1734_v29, %v744_v36 }
 0x5ab   :  { %v753_v52 = vsel %vm750_vm5, %v752_v46, %v748_v45 }
 0x5ac   :  { %v773_v61 = vmul.f32 %v753_v52, %v2192_v48 }
 0x5fc   :  { %v758_v47 = vpop.permute.xlu0 %757 }
 0x5fd   :  { %v760_v49 = vmul.f32 %v758_v47, %v753_v52 }
 0x5ff   :  { %762 = vrot.lane.b32.xlu2 %v760_v49, %s1971_s14 }
 0x616   :  { %v701_v13 = vpop.permute.xlu1 %700 }
 0x617   :  { %v703_v50 = vadd.f32 %v701_v13, %v646_v53  ;;  %v767_v53 = vsub.f32 1.0, %v753_v52 }
 0x619   :  { %1735 = vtanh.f32 %v703_v50 }
 0x61f   :  { %v1736_v51 = vpop.eup %1735 }
 0x620   :  { %707 = vrot.lane.b32.xlu0 %v1736_v51, %s1973_s2 }
 0x659   :  { %v763_v54 = vpop.permute.xlu2 %762 }
 0x65a   :  { %v765_v55 = vadd.f32 %v763_v54, %v2078_v60 }
 0x65c   :  { %1737 = vtanh.f32 %v765_v55 }
 0x662   :  { %v1738_v56 = vpop.eup %1737 }
 0x663   :  { %769 = vrot.lane.b32.xlu1 %v1738_v56, %s1973_s2 }
 0x692   :  { %v708_v38 = vpop.permute.xlu0 %707 }
 0x693   :  { %v710_v40 = vmul.f32 %v708_v38, %v705_v57 }
 0x695   :  { %v2223_v41 = vadd.f32 %v711_v39, %v710_v40 }
 0x697   :  { %801 = vrot.lane.b32.xlu2 %v2223_v41, %s1973_s2 }
 0x6d5   :  { %v770_v44 = vpop.permute.xlu1 %769 }
 0x6d6   :  { %v772_v62 = vmul.f32 %v770_v44, %v767_v53 }
 0x6d8   :  { %v2228_v60 = vadd.f32 %v773_v61, %v772_v62 }
 0x6da   :  { %776 = vrot.lane.b32.xlu0 %v2228_v60, %s1973_s2 }
 0x6f1   :  { %v802_v63 = vpop.permute.xlu2 %801 }
 0x6f2   :  { %1665 = vmatmul.msk.f32.vlgmr.msrb.gmra.mxu0 %vm406_vm4, %v802_v63 }
 0x6f3   :  { %1248 = vmatpush.msrb.mxu0 %v2113_v3 }
 0x6f5   :  { %1249 = vmatpush.msrb.mxu0 %v2115_v4 }
 0x6f7   :  { %1250 = vmatpush.msrb.mxu0 %v2119_v8 }
 0x6f9   :  { %1251 = vmatpush.msrb.mxu0 %v2125_v37 }
 0x74c   :  { %v777_v43 = vpop.permute.xlu0 %776 }
 0x74d   :  { %1664 = vmatmul.msk.f32.vlgmr.msra.gmra.mxu3 %vm406_vm4, %v777_v43  ;;  %1667 = vmatmul.msk.f32.vlgmr.msrb.gmra.mxu1 %vm406_vm4, %v777_v43 }
 0x74e   :  { %1183 = vmatpush.msra.mxu3 %v2052_v0  ;;  %1273 = vmatpush.msrb.mxu1 %v2095_v58 }
 0x750   :  { %1184 = vmatpush.msra.mxu3 %v2054_v5  ;;  %1274 = vmatpush.msrb.mxu1 %v2097_v59 }
 0x752   :  { %1185 = vmatpush.msra.mxu3 %v2057_v6  ;;  %1275 = vmatpush.msrb.mxu1 %v2102_v1 }
 0x754   :  { %1186 = vmatpush.msra.mxu3 %v2064_v15  ;;  %1276 = vmatpush.msrb.mxu1 %v2104_v2 }
 0x76f   :  { %v822_v48 = vpop.f32.mrf.mxu0 }
 0x770   :  { %v845_v9 = vadd.f32 %v822_v48, %v2163_v19 }
 0x772   :  { %847 = vrot.lane.b32.xlu1 %v845_v9, %s1971_s14 }
 0x7ca   :  { %v884_v0 = vpop.f32.mrf.mxu1 }
 0x7cb   :  { %v907_v10 = vadd.f32 %v884_v0, %v2090_v33  ;;  %v887_v52 = vadd.f32 %v884_v0, %v2080_v7 }
 0x7cd   :  { %909 = vrot.lane.b32.xlu2 %v907_v10, %s1971_s14  ;;  %v1668_v49 = vmul.f32 -1.442695, %v887_v52 }
 0x7d0   :  { %v797_v11 = vpop.f32.mrf.mxu3 }
 0x7d1   :  { %v798_v12 = vadd.f32 %v2174_v23, %v797_v11 }
 0x7d3   :  { %v825_v14 = vadd.f32 %v822_v48, %v798_v12 }
 0x7d5   :  { %v1666_v17 = vmul.f32 -1.442695, %v825_v14 }
 0x7d7   :  { %1739 = vpow2.f32 %v1666_v17 }
 0x7dd   :  { %v1740_v20 = vpop.eup %1739 }
 0x7de   :  { %v829_v21 = vadd.f32 1.0, %v1740_v20 }
 0x7e0   :  { %1741 = vrcp.f32 %v829_v21  ;;  %v841_v31 = vand.u32 2147483648, %v829_v21  ;;  %v839_v35 = vand.u32 2147483647, %v829_v21  ;;  %vm835_vm7 = vweird.f32 %v829_v21 }
 0x7e1   :  { %1743 = vpow2.f32 %v1668_v49 }
 0x7e2   :  { %v842_v42 = vor.u32 1.1754944e-38, %v841_v31  ;;  %vm840_vm9 = vcmp.eq.f32.partialorder %v839_v35, 8.507059e+37 }
 0x7e4   :  { %v848_v46 = vpop.permute.xlu1 %847 }
 0x7e6   :  { %v1742_v26 = vpop.eup %1741 }
 0x7e7   :  { %v831_v28 = vmul.f32 %v1742_v26, %v829_v21  ;;  %vm836_vm6 = vweird.f32 %v1742_v26  ;;  %v1744_v13 = vpop.eup %1743 }
 0x7e8   :  { %vm837_vm8 = vmor %vm835_vm7, %vm836_vm6  ;;  %v891_v50 = vadd.f32 1.0, %v1744_v13 }
 0x7e9   :  { %v832_v29 = vsub.f32 1.0, %v831_v28 }
 0x7ea   :  { %1745 = vrcp.f32 %v891_v50  ;;  %v903_v38 = vand.u32 2147483648, %v891_v50  ;;  %vm897_vm11 = vweird.f32 %v891_v50  ;;  %v901_v39 = vand.u32 2147483647, %v891_v50 }
 0x7eb   :  { %v833_v34 = vmul.f32 %v1742_v26, %v832_v29 }
 0x7ec   :  { %v904_v53 = vor.u32 1.1754944e-38, %v903_v38  ;;  %vm902_vm13 = vcmp.eq.f32.partialorder %v901_v39, 8.507059e+37 }
 0x7ed   :  { %v834_v36 = vadd.f32 %v1742_v26, %v833_v34 }
 0x7ef   :  { %v838_v27 = vsel %vm837_vm8, %v1742_v26, %v834_v36 }
 0x7f0   :  { %v843_v45 = vsel %vm840_vm9, %v842_v42, %v838_v27  ;;  %v1746_v51 = vpop.eup %1745 }
 0x7f1   :  { %v850_v47 = vmul.f32 %v848_v46, %v843_v45  ;;  %v893_v54 = vmul.f32 %v1746_v51, %v891_v50  ;;  %vm898_vm10 = vweird.f32 %v1746_v51  ;;  %v857_v11 = vsub.f32 1.0, %v843_v45 }
 0x7f2   :  { %vm899_vm12 = vmor %vm897_vm11, %vm898_vm10  ;;  %v863_v17 = vmul.f32 %v843_v45, %v2223_v41 }
 0x7f3   :  { %852 = vrot.lane.b32.xlu0 %v850_v47, %s1971_s14  ;;  %v894_v55 = vsub.f32 1.0, %v893_v54 }
 0x7f5   :  { %v895_v56 = vmul.f32 %v1746_v51, %v894_v55 }
 0x7f7   :  { %v896_v57 = vadd.f32 %v1746_v51, %v895_v56 }
 0x7f9   :  { %v900_v40 = vsel %vm899_vm12, %v1746_v51, %v896_v57 }
 0x7fa   :  { %v905_v61 = vsel %vm902_vm13, %v904_v53, %v900_v40 }
 0x7fb   :  { %v925_v28 = vmul.f32 %v905_v61, %v2228_v60  ;;  %v2275_v60 = vld [vmem:[#allocation8 + $0x18] sm:$0xff] }
 0x827   :  { %v910_v44 = vpop.permute.xlu2 %909 }
 0x828   :  { %v912_v62 = vmul.f32 %v910_v44, %v905_v61 }
 0x82a   :  { %914 = vrot.lane.b32.xlu1 %v912_v62, %s1971_s14 }
 0x865   :  { %v853_v63 = vpop.permute.xlu0 %852 }
 0x866   :  { %v855_v43 = vadd.f32 %v853_v63, %v798_v12  ;;  %v919_v12 = vsub.f32 1.0, %v905_v61 }
 0x868   :  { %1747 = vtanh.f32 %v855_v43 }
 0x86e   :  { %v1748_v48 = vpop.eup %1747 }
 0x86f   :  { %859 = vrot.lane.b32.xlu2 %v1748_v48, %s1973_s2 }
 0x89c   :  { %v915_v9 = vpop.permute.xlu1 %914 }
 0x89d   :  { %v917_v0 = vadd.f32 %v915_v9, %v2080_v7 }
 0x89f   :  { %1749 = vtanh.f32 %v917_v0 }
 0x8a5   :  { %v1750_v10 = vpop.eup %1749 }
 0x8a6   :  { %921 = vrot.lane.b32.xlu0 %v1750_v10, %s1973_s2 }
 0x8c9   :  { %v860_v14 = vpop.permute.xlu2 %859 }
 0x8ca   :  { %v862_v20 = vmul.f32 %v860_v14, %v857_v11 }
 0x8cc   :  { %v2259_v21 = vadd.f32 %v863_v17, %v862_v20 }
 0x8ce   :  { %953 = vrot.lane.b32.xlu1 %v2259_v21, %s1973_s2 }
 0x918   :  { %v922_v26 = vpop.permute.xlu0 %921 }
 0x919   :  { %v924_v29 = vmul.f32 %v922_v26, %v919_v12 }
 0x91b   :  { %v2264_v7 = vadd.f32 %v925_v28, %v924_v29 }
 0x91d   :  { %928 = vrot.lane.b32.xlu2 %v2264_v7, %s1973_s2 }
 0x940   :  { %v954_v31 = vpop.permute.xlu1 %953 }
 0x941   :  { %1670 = vmatmul.msk.f32.vlgmr.msrb.gmra.mxu3 %vm406_vm4, %v954_v31 }
 0x942   :  { %1400 = vmatpush.msrb.mxu3 %v2113_v3 }
 0x944   :  { %1401 = vmatpush.msrb.mxu3 %v2115_v4 }
 0x946   :  { %1402 = vmatpush.msrb.mxu3 %v2119_v8 }
 0x948   :  { %1403 = vmatpush.msrb.mxu3 %v2125_v37 }
 0x977   :  { %v929_v41 = vpop.permute.xlu2 %928 }
 0x978   :  { %1669 = vmatmul.msk.f32.vlgmr.msrb.gmra.mxu2 %vm406_vm4, %v929_v41  ;;  %1672 = vmatmul.msk.f32.vlgmr.msra.gmra.mxu0 %vm406_vm4, %v929_v41 }
 0x979   :  { %1335 = vmatpush.msrb.mxu2 %v2275_v60  ;;  %1425 = vmatpush.msra.mxu0 %v2095_v58 }
 0x97b   :  { %1336 = vmatpush.msrb.mxu2 %v2054_v5  ;;  %1426 = vmatpush.msra.mxu0 %v2097_v59 }
 0x97d   :  { %1337 = vmatpush.msrb.mxu2 %v2057_v6  ;;  %1427 = vmatpush.msra.mxu0 %v2102_v1 }
 0x97f   :  { %1338 = vmatpush.msrb.mxu2 %v2064_v15  ;;  %1428 = vmatpush.msra.mxu0 %v2104_v2 }
 0x9c4   :  { %v974_v34 = vpop.f32.mrf.mxu3 }
 0x9c5   :  { %v997_v35 = vadd.f32 %v974_v34, %v2163_v19 }
 0x9c7   :  { %999 = vrot.lane.b32.xlu1 %v997_v35, %s1971_s14 }
 0x9f5   :  { %v1036_v36 = vpop.f32.mrf.mxu0 }
 0x9f6   :  { %v1059_v42 = vadd.f32 %v1036_v36, %v2090_v33  ;;  %v1039_v57 = vadd.f32 %v1036_v36, %v2082_v16 }
 0x9f8   :  { %1061 = vrot.lane.b32.xlu0 %v1059_v42, %s1971_s14  ;;  %v1673_v53 = vmul.f32 -1.442695, %v1039_v57 }
 0x9fb   :  { %v949_v5 = vpop.f32.mrf.mxu2 }
 0x9fc   :  { %v950_v27 = vadd.f32 %v2174_v23, %v949_v5 }
 0x9fe   :  { %v977_v6 = vadd.f32 %v974_v34, %v950_v27 }
 0xa00   :  { %v1671_v45 = vmul.f32 -1.442695, %v977_v6 }
 0xa02   :  { %1751 = vpow2.f32 %v1671_v45 }
 0xa08   :  { %v1752_v46 = vpop.eup %1751 }
 0xa09   :  { %v981_v15 = vadd.f32 1.0, %v1752_v46 }
 0xa0b   :  { %1753 = vrcp.f32 %v981_v15  ;;  %v993_v51 = vand.u32 2147483648, %v981_v15  ;;  %vm987_vm15 = vweird.f32 %v981_v15  ;;  %v991_v54 = vand.u32 2147483647, %v981_v15 }
 0xa0c   :  { %1755 = vpow2.f32 %v1673_v53 }
 0xa0d   :  { %v994_v56 = vor.u32 1.1754944e-38, %v993_v51  ;;  %vm992_vm1 = vcmp.eq.f32.partialorder %v991_v54, 8.507059e+37 }
 0xa11   :  { %v1754_v47 = vpop.eup %1753 }
 0xa12   :  { %v983_v52 = vmul.f32 %v1754_v47, %v981_v15  ;;  %vm988_vm14 = vweird.f32 %v1754_v47  ;;  %v1756_v44 = vpop.eup %1755 }
 0xa13   :  { %vm989_vm0 = vmor %vm987_vm15, %vm988_vm14  ;;  %v1043_v61 = vadd.f32 1.0, %v1756_v44 }
 0xa14   :  { %v984_v49 = vsub.f32 1.0, %v983_v52 }
 0xa15   :  { %1757 = vrcp.f32 %v1043_v61  ;;  %v1055_v0 = vand.u32 2147483648, %v1043_v61  ;;  %vm1049_vm3 = vweird.f32 %v1043_v61  ;;  %v1053_v10 = vand.u32 2147483647, %v1043_v61 }
 0xa16   :  { %v985_v13 = vmul.f32 %v1754_v47, %v984_v49 }
 0xa17   :  { %v1056_v14 = vor.u32 1.1754944e-38, %v1055_v0  ;;  %vm1054_vm6 = vcmp.eq.f32.partialorder %v1053_v10, 8.507059e+37 }
 0xa18   :  { %v986_v50 = vadd.f32 %v1754_v47, %v985_v13 }
 0xa1a   :  { %v990_v55 = vsel %vm989_vm0, %v1754_v47, %v986_v50 }
 0xa1b   :  { %v995_v39 = vsel %vm992_vm1, %v994_v56, %v990_v55  ;;  %v1758_v62 = vpop.eup %1757 }
 0xa1c   :  { %v1045_v63 = vmul.f32 %v1758_v62, %v1043_v61  ;;  %vm1050_vm2 = vweird.f32 %v1758_v62  ;;  %v1009_v35 = vsub.f32 1.0, %v995_v39  ;;  %v1015_v42 = vmul.f32 %v995_v39, %v2259_v21 }
 0xa1d   :  { %vm1051_vm5 = vmor %vm1049_vm3, %vm1050_vm2 }
 0xa1e   :  { %v1046_v43 = vsub.f32 1.0, %v1045_v63 }
 0xa20   :  { %v1047_v48 = vmul.f32 %v1758_v62, %v1046_v43 }
 0xa22   :  { %v1048_v9 = vadd.f32 %v1758_v62, %v1047_v48 }
 0xa24   :  { %v1052_v11 = vsel %vm1051_vm5, %v1758_v62, %v1048_v9 }
 0xa25   :  { %v1057_v20 = vsel %vm1054_vm6, %v1056_v14, %v1052_v11 }
 0xa26   :  { %v1077_v46 = vmul.f32 %v1057_v20, %v2264_v7  ;;  %v1806_v7 = vld [vmem:[#allocation8 + $0x10] sm:$0xff] }
 0xa39   :  { %v1000_v38 = vpop.permute.xlu1 %999 }
 0xa3a   :  { %v1002_v40 = vmul.f32 %v1000_v38, %v995_v39 }
 0xa3c   :  { %1004 = vrot.lane.b32.xlu0 %v1002_v40, %s1971_s14 }
 0xa6a   :  { %v1062_v17 = vpop.permute.xlu0 %1061 }
 0xa6b   :  { %v1064_v12 = vmul.f32 %v1062_v17, %v1057_v20 }
 0xa6d   :  { %1066 = vrot.lane.b32.xlu2 %v1064_v12, %s1971_s14 }
 0xaae   :  { %v1005_v26 = vpop.permute.xlu0 %1004 }
 0xaaf   :  { %v1007_v28 = vadd.f32 %v1005_v26, %v950_v27  ;;  %v1071_v27 = vsub.f32 1.0, %v1057_v20 }
 0xab1   :  { %1759 = vtanh.f32 %v1007_v28 }
 0xab7   :  { %v1760_v29 = vpop.eup %1759 }
 0xab8   :  { %1011 = vrot.lane.b32.xlu2 %v1760_v29, %s1973_s2 }
 0xac7   :  { %v1067_v31 = vpop.permute.xlu2 %1066 }
 0xac8   :  { %v1069_v41 = vadd.f32 %v1067_v31, %v2082_v16 }
 0xaca   :  { %1761 = vtanh.f32 %v1069_v41 }
 0xad0   :  { %v1762_v34 = vpop.eup %1761 }
 0xad1   :  { %1073 = vrot.lane.b32.xlu1 %v1762_v34, %s1973_s2 }
 0xb12   :  { %v1012_v36 = vpop.permute.xlu2 %1011 }
 0xb13   :  { %v1014_v5 = vmul.f32 %v1012_v36, %v1009_v35 }
 0xb15   :  { %v2297_v6 = vadd.f32 %v1015_v42, %v1014_v5 }
 0xb17   :  { %1105 = vrot.lane.b32.xlu1 %v2297_v6, %s1973_s2 }
 0xb43   :  { %v1074_v45 = vpop.permute.xlu1 %1073 }
 0xb44   :  { %v1076_v15 = vmul.f32 %v1074_v45, %v1071_v27 }
 0xb46   :  { %v2302_v16 = vadd.f32 %v1077_v46, %v1076_v15 }
 0xb48   :  { %1080 = vrot.lane.b32.xlu0 %v2302_v16, %s1973_s2 }
 0xb89   :  { %v1106_v47 = vpop.permute.xlu1 %1105 }
 0xb8a   :  { %1675 = vmatmul.msk.f32.vlgmr.msra.gmra.mxu2 %vm406_vm4, %v1106_v47 }
 0xb8b   :  { %1552 = vmatpush.msra.mxu2 %v2113_v3  ;;  %v1807_v3 = vld [vmem:[#allocation8 + $0x8] sm:$0xff] }
 0xb8d   :  { %1553 = vmatpush.msra.mxu2 %v2115_v4  ;;  %v1808_v4 = vld [vmem:[#allocation8] sm:$0xff] }
 0xb8f   :  { %1554 = vmatpush.msra.mxu2 %v2119_v8 }
 0xb91   :  { %1555 = vmatpush.msra.mxu2 %v2125_v37 }
 0xbba   :  { %v1081_v21 = vpop.permute.xlu0 %1080 }
 0xbbb   :  { %1674 = vmatmul.msk.f32.vlgmr.msra.gmra.mxu1 %vm406_vm4, %v1081_v21  ;;  %1677 = vmatmul.msk.f32.vlgmr.msra.gmra.mxu3 %vm406_vm4, %v1081_v21 }
 0xbbc   :  { %1487 = vmatpush.msra.mxu1 %v2275_v60  ;;  %1577 = vmatpush.msra.mxu3 %v2095_v58 }
 0xbbe   :  { %1488 = vmatpush.msra.mxu1 %v1806_v7  ;;  %1578 = vmatpush.msra.mxu3 %v2097_v59 }
 0xbc0   :  { %1489 = vmatpush.msra.mxu1 %v1807_v3  ;;  %1579 = vmatpush.msra.mxu3 %v2102_v1 }
 0xbc2   :  { %1490 = vmatpush.msra.mxu1 %v1808_v4  ;;  %1580 = vmatpush.msra.mxu3 %v2104_v2 }
 0xc0d   :  { %v1126_v8 = vpop.f32.mrf.mxu2 }
 0xc0e   :  { %v1149_v37 = vadd.f32 %v1126_v8, %v2163_v19 }
 0xc10   :  { %1151 = vrot.lane.b32.xlu0 %v1149_v37, %s1971_s14 }
 0xc38   :  { %v1101_v52 = vpop.f32.mrf.mxu1 }
 0xc39   :  { %v1102_v59 = vadd.f32 %v2174_v23, %v1101_v52 }
 0xc3b   :  { %v1129_v49 = vadd.f32 %v1126_v8, %v1102_v59 }
 0xc3d   :  { %v1676_v13 = vmul.f32 -1.442695, %v1129_v49 }
 0xc3e   :  { %v1188_v60 = vpop.f32.mrf.mxu3 }
 0xc3f   :  { %v1211_v58 = vadd.f32 %v1188_v60, %v2090_v33  ;;  %1763 = vpow2.f32 %v1676_v13  ;;  %v1191_v2 = vadd.f32 %v1188_v60, %v2084_v24 }
 0xc41   :  { %1213 = vrot.lane.b32.xlu2 %v1211_v58, %s1971_s14  ;;  %v1678_v54 = vmul.f32 -1.442695, %v1191_v2 }
 0xc45   :  { %v1764_v1 = vpop.eup %1763 }
 0xc46   :  { %v1133_v50 = vadd.f32 1.0, %v1764_v1 }
 0xc48   :  { %1765 = vrcp.f32 %v1133_v50  ;;  %v1145_v53 = vand.u32 2147483648, %v1133_v50  ;;  %vm1139_vm8 = vweird.f32 %v1133_v50  ;;  %v1143_v44 = vand.u32 2147483647, %v1133_v50 }
 0xc49   :  { %1767 = vpow2.f32 %v1678_v54 }
 0xc4a   :  { %v1146_v62 = vor.u32 1.1754944e-38, %v1145_v53  ;;  %vm1144_vm10 = vcmp.eq.f32.partialorder %v1143_v44, 8.507059e+37 }
 0xc4e   :  { %v1766_v51 = vpop.eup %1765 }
 0xc4f   :  { %v1135_v55 = vmul.f32 %v1766_v51, %v1133_v50  ;;  %v1768_v38 = vpop.eup %1767  ;;  %vm1140_vm7 = vweird.f32 %v1766_v51 }
 0xc50   :  { %v1195_v39 = vadd.f32 1.0, %v1768_v38  ;;  %vm1141_vm9 = vmor %vm1139_vm8, %vm1140_vm7 }
 0xc51   :  { %v1136_v56 = vsub.f32 1.0, %v1135_v55 }
 0xc52   :  { %1769 = vrcp.f32 %v1195_v39  ;;  %v1207_v17 = vand.u32 2147483648, %v1195_v39  ;;  %vm1201_vm12 = vweird.f32 %v1195_v39  ;;  %v1205_v20 = vand.u32 2147483647, %v1195_v39 }
 0xc53   :  { %v1137_v57 = vmul.f32 %v1766_v51, %v1136_v56 }
 0xc54   :  { %v1208_v26 = vor.u32 1.1754944e-38, %v1207_v17  ;;  %vm1206_vm14 = vcmp.eq.f32.partialorder %v1205_v20, 8.507059e+37 }
 0xc55   :  { %v1138_v40 = vadd.f32 %v1766_v51, %v1137_v57 }
 0xc57   :  { %v1142_v61 = vsel %vm1141_vm9, %v1766_v51, %v1138_v40 }
 0xc58   :  { %v1147_v63 = vsel %vm1144_vm10, %v1146_v62, %v1142_v61  ;;  %v1770_v9 = vpop.eup %1769 }
 0xc59   :  { %v1197_v0 = vmul.f32 %v1770_v9, %v1195_v39  ;;  %vm1202_vm11 = vweird.f32 %v1770_v9  ;;  %v1161_v27 = vsub.f32 1.0, %v1147_v63  ;;  %v1167_v46 = vmul.f32 %v1147_v63, %v2297_v6 }
 0xc5a   :  { %vm1203_vm13 = vmor %vm1201_vm12, %vm1202_vm11 }
 0xc5b   :  { %v1198_v10 = vsub.f32 1.0, %v1197_v0 }
 0xc5d   :  { %v1199_v11 = vmul.f32 %v1770_v9, %v1198_v10 }
 0xc5f   :  { %v1200_v14 = vadd.f32 %v1770_v9, %v1199_v11 }
 0xc61   :  { %v1204_v12 = vsel %vm1203_vm13, %v1770_v9, %v1200_v14 }
 0xc62   :  { %v1209_v29 = vsel %vm1206_vm14, %v1208_v26, %v1204_v12 }
 0xc63   :  { %v1223_v21 = vsub.f32 1.0, %v1209_v29  ;;  %v1229_v3 = vmul.f32 %v1209_v29, %v2302_v16 }
 0xc82   :  { %v1152_v43 = vpop.permute.xlu0 %1151 }
 0xc83   :  { %v1154_v48 = vmul.f32 %v1152_v43, %v1147_v63 }
 0xc85   :  { %1156 = vrot.lane.b32.xlu2 %v1154_v48, %s1971_s14 }
 0xc9b   :  { %v1214_v28 = vpop.permute.xlu2 %1213 }
 0xc9c   :  { %v1216_v31 = vmul.f32 %v1214_v28, %v1209_v29 }
 0xc9e   :  { %1218 = vrot.lane.b32.xlu1 %v1216_v31, %s1971_s14 }
 0xcdf   :  { %v1157_v41 = vpop.permute.xlu2 %1156 }
 0xce0   :  { %v1159_v34 = vadd.f32 %v1157_v41, %v1102_v59 }
 0xce2   :  { %1771 = vtanh.f32 %v1159_v34 }
 0xce8   :  { %v1772_v35 = vpop.eup %1771 }
 0xce9   :  { %1163 = vrot.lane.b32.xlu1 %v1772_v35, %s1973_s2 }
 0xd10   :  { %v1219_v36 = vpop.permute.xlu1 %1218 }
 0xd11   :  { %v1221_v42 = vadd.f32 %v1219_v36, %v2084_v24 }
 0xd13   :  { %1773 = vtanh.f32 %v1221_v42 }
 0xd19   :  { %v1774_v5 = vpop.eup %1773 }
 0xd1a   :  { %1225 = vrot.lane.b32.xlu0 %v1774_v5, %s1973_s2 }
 0xd5b   :  { %v1164_v45 = vpop.permute.xlu1 %1163 }
 0xd5c   :  { %v1166_v15 = vmul.f32 %v1164_v45, %v1161_v27 }
 0xd5e   :  { %v2330_v47 = vadd.f32 %v1167_v46, %v1166_v15 }
 0xd60   :  { %1257 = vrot.lane.b32.xlu0 %v2330_v47, %s1973_s2 }
 0xd8c   :  { %v1226_v7 = vpop.permute.xlu0 %1225 }
 0xd8d   :  { %v1228_v4 = vmul.f32 %v1226_v7, %v1223_v21 }
 0xd8f   :  { %v2335_v24 = vadd.f32 %v1229_v3, %v1228_v4 }
 0xd91   :  { %1232 = vrot.lane.b32.xlu2 %v2335_v24, %s1973_s2 }
 0xdd2   :  { %v1258_v8 = vpop.permute.xlu0 %1257 }
 0xdd3   :  { %1680 = vmatmul.msk.f32.vlgmr.msrb.gmra.mxu1 %vm406_vm4, %v1258_v8 }
 0xdeb   :  { %v1233_v6 = vpop.permute.xlu2 %1232 }
 0xdec   :  { %1679 = vmatmul.msk.f32.vlgmr.msrb.gmra.mxu0 %vm406_vm4, %v1233_v6  ;;  %1682 = vmatmul.msk.f32.vlgmr.msrb.gmra.mxu2 %vm406_vm4, %v1233_v6 }
 0xe50   :  { %v1278_v37 = vpop.f32.mrf.mxu1 }
 0xe51   :  { %v1301_v60 = vadd.f32 %v1278_v37, %v2163_v19 }
 0xe53   :  { %1303 = vrot.lane.b32.xlu1 %v1301_v60, %s1971_s14 }
 0xe69   :  { %v1253_v52 = vpop.f32.mrf.mxu0 }
 0xe6a   :  { %v1254_v59 = vadd.f32 %v2174_v23, %v1253_v52 }
 0xe6c   :  { %v1281_v49 = vadd.f32 %v1278_v37, %v1254_v59 }
 0xe6e   :  { %v1681_v13 = vmul.f32 -1.442695, %v1281_v49 }
 0xe6f   :  { %v1340_v16 = vpop.f32.mrf.mxu2 }
 0xe70   :  { %v1363_v58 = vadd.f32 %v1340_v16, %v2090_v33  ;;  %v1343_v1 = vadd.f32 %v1340_v16, %v2088_v32  ;;  %1775 = vpow2.f32 %v1681_v13 }
 0xe72   :  { %1365 = vrot.lane.b32.xlu2 %v1363_v58, %s1971_s14  ;;  %v1683_v50 = vmul.f32 -1.442695, %v1343_v1  ;;  %v2373_v58 = vld [vmem:[%s2410_s6] ss:$0 sm:$0xff]  ;;  %s1974_s6 = smov [#allocation12]  }
 0xe73   :  { %s1637_s22 = sshll.u32 %s1974_s6, 4  ;;  %s1638_s22 = int_to_ptr.vmem [resolvable:$true] %s1637_s22 }
 0xe74   :  { %1777 = vpow2.f32 %v1683_v50 }
 0xe76   :  { %v1776_v2 = vpop.eup %1775 }
 0xe77   :  { %v1285_v51 = vadd.f32 1.0, %v1776_v2 }
 0xe79   :  { %1779 = vrcp.f32 %v1285_v51  ;;  %v1297_v61 = vand.u32 2147483648, %v1285_v51  ;;  %vm1291_vm0 = vweird.f32 %v1285_v51  ;;  %v1295_v62 = vand.u32 2147483647, %v1285_v51 }
 0xe7a   :  { %v1778_v54 = vpop.eup %1777 }
 0xe7b   :  { %v1347_v55 = vadd.f32 1.0, %v1778_v54  ;;  %v1298_v48 = vor.u32 1.1754944e-38, %v1297_v61  ;;  %vm1296_vm2 = vcmp.eq.f32.partialorder %v1295_v62, 8.507059e+37 }
 0xe7d   :  { %1781 = vrcp.f32 %v1347_v55  ;;  %v1359_v14 = vand.u32 2147483648, %v1347_v55  ;;  %vm1353_vm5 = vweird.f32 %v1347_v55  ;;  %v1357_v17 = vand.u32 2147483647, %v1347_v55 }
 0xe7f   :  { %v1780_v56 = vpop.eup %1779  ;;  %v1360_v12 = vor.u32 1.1754944e-38, %v1359_v14  ;;  %vm1358_vm7 = vcmp.eq.f32.partialorder %v1357_v17, 8.507059e+37 }
 0xe80   :  { %v1287_v57 = vmul.f32 %v1780_v56, %v1285_v51  ;;  %vm1292_vm15 = vweird.f32 %v1780_v56 }
 0xe81   :  { %vm1293_vm1 = vmor %vm1291_vm0, %vm1292_vm15 }
 0xe82   :  { %v1288_v39 = vsub.f32 1.0, %v1287_v57 }
 0xe83   :  { %v1782_v38 = vpop.eup %1781 }
 0xe84   :  { %v1349_v40 = vmul.f32 %v1782_v38, %v1347_v55  ;;  %v1289_v53 = vmul.f32 %v1780_v56, %v1288_v39  ;;  %vm1354_vm3 = vweird.f32 %v1782_v38 }
 0xe85   :  { %vm1355_vm6 = vmor %vm1353_vm5, %vm1354_vm3 }
 0xe86   :  { %v1350_v23 = vsub.f32 1.0, %v1349_v40  ;;  %v1290_v44 = vadd.f32 %v1780_v56, %v1289_v53 }
 0xe88   :  { %v1351_v63 = vmul.f32 %v1782_v38, %v1350_v23  ;;  %v1294_v43 = vsel %vm1293_vm1, %v1780_v56, %v1290_v44 }
 0xe89   :  { %v1299_v0 = vsel %vm1296_vm2, %v1298_v48, %v1294_v43 }
 0xe8a   :  { %v1352_v10 = vadd.f32 %v1782_v38, %v1351_v63  ;;  %v1313_v5 = vsub.f32 1.0, %v1299_v0  ;;  %v1319_v45 = vmul.f32 %v1299_v0, %v2330_v47 }
 0xe8c   :  { %v1356_v20 = vsel %vm1355_vm6, %v1782_v38, %v1352_v10 }
 0xe8d   :  { %v1361_v28 = vsel %vm1358_vm7, %v1360_v12, %v1356_v20 }
 0xe8e   :  { %v1375_v21 = vsub.f32 1.0, %v1361_v28 }
 0xec5   :  { %v1304_v9 = vpop.permute.xlu1 %1303 }
 0xec6   :  { %v1306_v11 = vmul.f32 %v1304_v9, %v1299_v0 }
 0xec8   :  { %1308 = vrot.lane.b32.xlu0 %v1306_v11, %s1971_s14 }
 0xecc   :  { %v1366_v26 = vpop.permute.xlu2 %1365 }
 0xecd   :  { %v1368_v29 = vmul.f32 %v1366_v26, %v1361_v28 }
 0xecf   :  { %1370 = vrot.lane.b32.xlu1 %v1368_v29, %s1971_s14 }
 0xf3a   :  { %v1309_v31 = vpop.permute.xlu0 %1308 }
 0xf3b   :  { %v1311_v41 = vadd.f32 %v1309_v31, %v1254_v59  ;;  %v291_v59 = vadd.f32 %v2169_v22, %v2086_v30 }
 0xf3d   :  { %1783 = vtanh.f32 %v1311_v41  ;;  %v332_v13 = vadd.f32 %v2153_v18, %v291_v59 }
 0xf3f   :  { %v373_v50 = vadd.f32 %v2176_v25, %v332_v13 }
 0xf41   :  { %v1371_v34 = vpop.permute.xlu1 %1370 }
 0xf42   :  { %v1373_v35 = vadd.f32 %v1371_v34, %v2088_v32  ;;  %v1381_v32 = vmul.f32 %v1361_v28, %v2335_v24 }
 0xf43   :  { %v1784_v36 = vpop.eup %1783 }
 0xf44   :  { %1785 = vtanh.f32 %v1373_v35  ;;  %1315 = vrot.lane.b32.xlu2 %v1784_v36, %s1973_s2 }
 0xf4a   :  { %v1786_v42 = vpop.eup %1785 }
 0xf4b   :  { %1377 = vrot.lane.b32.xlu0 %v1786_v42, %s1973_s2 }
 0xf9e   :  { %v1316_v27 = vpop.permute.xlu2 %1315 }
 0xf9f   :  { %v1318_v46 = vmul.f32 %v1316_v27, %v1313_v5 }
 0xfa1   :  { %v2354_v15 = vadd.f32 %v1319_v45, %v1318_v46 }
 0xfa3   :  { %1409 = vrot.lane.b32.xlu1 %v2354_v15, %s1973_s2 }
 0xfbd   :  { %v1378_v7 = vpop.permute.xlu0 %1377 }
 0xfbe   :  { %v1380_v3 = vmul.f32 %v1378_v7, %v1375_v21 }
 0xfc0   :  { %v2359_v4 = vadd.f32 %v1381_v32, %v1380_v3 }
 0xfc2   :  { %1384 = vrot.lane.b32.xlu2 %v2359_v4, %s1973_s2 }
0x1015   :  { %v1410_v8 = vpop.permute.xlu1 %1409 }
0x1016   :  { %1685 = vmatmul.msk.f32.vlgmr.msra.gmra.mxu0 %vm406_vm4, %v1410_v8 }
0x101c   :  { %v1385_v47 = vpop.permute.xlu2 %1384 }
0x101d   :  { %1684 = vmatmul.msk.f32.vlgmr.msrb.gmra.mxu3 %vm406_vm4, %v1385_v47  ;;  %1687 = vmatmul.msk.f32.vlgmr.msra.gmra.mxu1 %vm406_vm4, %v1385_v47 }
0x1093   :  { %v1430_v6 = vpop.f32.mrf.mxu0 }
0x1094   :  { %v1453_v37 = vadd.f32 %v1430_v6, %v2163_v19 }
0x1096   :  { %1455 = vrot.lane.b32.xlu0 %v1453_v37, %s1971_s14 }
0x109a   :  { %v1492_v24 = vpop.f32.mrf.mxu1 }
0x109b   :  { %v1515_v60 = vadd.f32 %v1492_v24, %v2090_v33  ;;  %v1495_v33 = vadd.f32 %v1492_v24, %v373_v50 }
0x109d   :  { %1517 = vrot.lane.b32.xlu1 %v1515_v60, %s1971_s14  ;;  %v1688_v2 = vmul.f32 -1.442695, %v1495_v33 }
0x10a0   :  { %v1405_v16 = vpop.f32.mrf.mxu3 }
0x10a1   :  { %v1406_v52 = vadd.f32 %v2373_v58, %v1405_v16 }
0x10a3   :  { %v1433_v49 = vadd.f32 %v1430_v6, %v1406_v52 }
0x10a5   :  { %v1686_v1 = vmul.f32 -1.442695, %v1433_v49 }
0x10a7   :  { %1787 = vpow2.f32 %v1686_v1 }
0x10a8   :  { %1789 = vpow2.f32 %v1688_v2 }
0x10ad   :  { %v1788_v51 = vpop.eup %1787 }
0x10ae   :  { %v1437_v54 = vadd.f32 1.0, %v1788_v51  ;;  %v1790_v55 = vpop.eup %1789 }
0x10af   :  { %v1499_v56 = vadd.f32 1.0, %v1790_v55 }
0x10b0   :  { %1791 = vrcp.f32 %v1437_v54  ;;  %v1449_v25 = vand.u32 2147483648, %v1437_v54  ;;  %vm1443_vm9 = vweird.f32 %v1437_v54  ;;  %v1447_v23 = vand.u32 2147483647, %v1437_v54 }
0x10b1   :  { %1793 = vrcp.f32 %v1499_v56  ;;  %v1511_v0 = vand.u32 2147483648, %v1499_v56  ;;  %vm1505_vm13 = vweird.f32 %v1499_v56  ;;  %v1509_v10 = vand.u32 2147483647, %v1499_v56 }
0x10b2   :  { %v1450_v62 = vor.u32 1.1754944e-38, %v1449_v25  ;;  %vm1448_vm11 = vcmp.eq.f32.partialorder %v1447_v23, 8.507059e+37 }
0x10b3   :  { %v1512_v14 = vor.u32 1.1754944e-38, %v1511_v0  ;;  %vm1510_vm15 = vcmp.eq.f32.partialorder %v1509_v10, 8.507059e+37 }
0x10b6   :  { %v1792_v57 = vpop.eup %1791 }
0x10b7   :  { %v1439_v38 = vmul.f32 %v1792_v57, %v1437_v54  ;;  %v1794_v39 = vpop.eup %1793  ;;  %vm1444_vm8 = vweird.f32 %v1792_v57 }
0x10b8   :  { %v1501_v22 = vmul.f32 %v1794_v39, %v1499_v56  ;;  %vm1445_vm10 = vmor %vm1443_vm9, %vm1444_vm8  ;;  %vm1506_vm12 = vweird.f32 %v1794_v39 }
0x10b9   :  { %v1440_v30 = vsub.f32 1.0, %v1439_v38  ;;  %vm1507_vm14 = vmor %vm1505_vm13, %vm1506_vm12 }
0x10ba   :  { %v1502_v18 = vsub.f32 1.0, %v1501_v22 }
0x10bb   :  { %v1441_v40 = vmul.f32 %v1792_v57, %v1440_v30 }
0x10bc   :  { %v1503_v44 = vmul.f32 %v1794_v39, %v1502_v18 }
0x10bd   :  { %v1442_v53 = vadd.f32 %v1792_v57, %v1441_v40 }
0x10be   :  { %v1504_v48 = vadd.f32 %v1794_v39, %v1503_v44 }
0x10bf   :  { %v1446_v61 = vsel %vm1445_vm10, %v1792_v57, %v1442_v53 }
0x10c0   :  { %v1451_v63 = vsel %vm1448_vm11, %v1450_v62, %v1446_v61  ;;  %v1508_v11 = vsel %vm1507_vm14, %v1794_v39, %v1504_v48 }
0x10c1   :  { %v1513_v20 = vsel %vm1510_vm15, %v1512_v14, %v1508_v11  ;;  %v1465_v35 = vsub.f32 1.0, %v1451_v63  ;;  %v1471_v42 = vmul.f32 %v1451_v63, %v2354_v15 }
0x10c2   :  { %v1527_v45 = vsub.f32 1.0, %v1513_v20  ;;  %v1533_v21 = vmul.f32 %v1513_v20, %v2359_v4 }
0x1108   :  { %v1456_v43 = vpop.permute.xlu0 %1455 }
0x1109   :  { %v1458_v9 = vmul.f32 %v1456_v43, %v1451_v63 }
0x110b   :  { %1460 = vrot.lane.b32.xlu2 %v1458_v9, %s1971_s14 }
0x110f   :  { %v1518_v17 = vpop.permute.xlu1 %1517 }
0x1110   :  { %v1520_v12 = vmul.f32 %v1518_v17, %v1513_v20 }
0x1112   :  { %1522 = vrot.lane.b32.xlu0 %v1520_v12, %s1971_s14 }
0x1165   :  { %v1461_v26 = vpop.permute.xlu2 %1460 }
0x1166   :  { %v1463_v28 = vadd.f32 %v1461_v26, %v1406_v52 }
0x1168   :  { %1795 = vtanh.f32 %v1463_v28 }
0x116e   :  { %v1796_v29 = vpop.eup %1795 }
0x116f   :  { %1467 = vrot.lane.b32.xlu1 %v1796_v29, %s1973_s2 }
0x1184   :  { %v1523_v31 = vpop.permute.xlu0 %1522 }
0x1185   :  { %v1525_v41 = vadd.f32 %v1523_v31, %v373_v50 }
0x1187   :  { %1797 = vtanh.f32 %v1525_v41 }
0x118d   :  { %v1798_v34 = vpop.eup %1797 }
0x118e   :  { %1529 = vrot.lane.b32.xlu2 %v1798_v34, %s1973_s2 }
0x11e1   :  { %v1468_v36 = vpop.permute.xlu1 %1467 }
0x11e2   :  { %v1470_v5 = vmul.f32 %v1468_v36, %v1465_v35 }
0x11e4   :  { %v1472_v27 = vadd.f32 %v1471_v42, %v1470_v5 }
0x11e6   :  { %1561 = vrot.lane.b32.xlu0 %v1472_v27, %s1973_s2 }
0x11e8   :  { %v1530_v46 = vpop.permute.xlu2 %1529 }
0x11e9   :  { %v1532_v7 = vmul.f32 %v1530_v46, %v1527_v45 }
0x11eb   :  { %v1534_v32 = vadd.f32 %v1533_v21, %v1532_v7 }
0x11ed   :  { %1536 = vrot.lane.b32.xlu1 %v1534_v32, %s1973_s2 }
0x1258   :  { %v1562_v3 = vpop.permute.xlu0 %1561 }
0x1259   :  { %1690 = vmatmul.msk.f32.vlgmr.msra.gmra.mxu3 %vm406_vm4, %v1562_v3 }
0x125f   :  { %v1537_v8 = vpop.permute.xlu1 %1536 }
0x1260   :  { %1626 = vst.msk [vmem:[#allocation12] sm:$0xff] %vm406_vm4, %v1537_v8  ;;  %1689 = vmatmul.msk.f32.vlgmr.msra.gmra.mxu2 %vm406_vm4, %v1537_v8 }
0x12dc   :  { %v1582_v15 = vpop.f32.mrf.mxu3 }
0x12dd   :  { %v1605_v47 = vadd.f32 %v1582_v15, %v2163_v19 }
0x12df   :  { %1607 = vrot.lane.b32.xlu2 %v1605_v47, %s1971_s14 }
0x12e3   :  { %v1557_v6 = vpop.f32.mrf.mxu2 }
0x12e4   :  { %v1558_v4 = vadd.f32 %v2373_v58, %v1557_v6 }
0x12e6   :  { %v1585_v37 = vadd.f32 %v1582_v15, %v1558_v4 }
0x12e8   :  { %v1691_v24 = vmul.f32 -1.442695, %v1585_v37 }
0x12ea   :  { %1799 = vpow2.f32 %v1691_v24 }
0x12f0   :  { %v1800_v60 = vpop.eup %1799 }
0x12f1   :  { %v1589_v16 = vadd.f32 1.0, %v1800_v60 }
0x12f3   :  { %1801 = vrcp.f32 %v1589_v16  ;;  %v1601_v50 = vand.u32 2147483648, %v1589_v16  ;;  %vm1595_vm1 = vweird.f32 %v1589_v16  ;;  %v1599_v19 = vand.u32 2147483647, %v1589_v16 }
0x12f5   :  { %v1602_v2 = vor.u32 1.1754944e-38, %v1601_v50  ;;  %vm1600_vm3 = vcmp.eq.f32.partialorder %v1599_v19, 8.507059e+37 }
0x12f9   :  { %v1802_v52 = vpop.eup %1801 }
0x12fa   :  { %v1591_v59 = vmul.f32 %v1802_v52, %v1589_v16  ;;  %vm1596_vm0 = vweird.f32 %v1802_v52 }
0x12fb   :  { %vm1597_vm2 = vmor %vm1595_vm1, %vm1596_vm0 }
0x12fc   :  { %v1592_v49 = vsub.f32 1.0, %v1591_v59 }
0x12fe   :  { %v1593_v13 = vmul.f32 %v1802_v52, %v1592_v49 }
0x1300   :  { %v1594_v1 = vadd.f32 %v1802_v52, %v1593_v13 }
0x1302   :  { %v1598_v33 = vsel %vm1597_vm2, %v1802_v52, %v1594_v1 }
0x1303   :  { %v1603_v51 = vsel %vm1600_vm3, %v1602_v2, %v1598_v33 }
0x1304   :  { %v1617_v38 = vsub.f32 1.0, %v1603_v51  ;;  %v1623_v30 = vmul.f32 %v1603_v51, %v1472_v27 }
0x1339   :  { %v1608_v58 = vpop.permute.xlu2 %1607 }
0x133a   :  { %v1610_v54 = vmul.f32 %v1608_v58, %v1603_v51 }
0x133c   :  { %1612 = vrot.lane.b32.xlu0 %v1610_v54, %s1971_s14 }
0x13ae   :  { %v1613_v55 = vpop.permute.xlu0 %1612 }
0x13af   :  { %v1615_v56 = vadd.f32 %v1613_v55, %v1558_v4 }
0x13b1   :  { %1803 = vtanh.f32 %v1615_v56 }
0x13b7   :  { %v1804_v57 = vpop.eup %1803 }
0x13b8   :  { %1619 = vrot.lane.b32.xlu1 %v1804_v57, %s1973_s2 }
0x142a   :  { %v1620_v39 = vpop.permute.xlu1 %1619 }
0x142b   :  { %v1622_v22 = vmul.f32 %v1620_v39, %v1617_v38 }
0x142d   :  { %v1624_v40 = vadd.f32 %v1623_v30, %v1622_v22 }
0x142f   :  { %1628 = vrot.lane.b32.xlu2 %v1624_v40, %s1973_s2 }
0x1489   :  { %v1629_v18 = vpop.permute.xlu2 %1628 }
0x148a   :  { %1632 = vst.msk [vmem:[#allocation12 + $0x8] sm:$0xff] %vm406_vm4, %v1629_v18 }
0x148b   :  { %1645 = dma.vmem_to_hbm [thread:$0]  %s1638_s22, 256, %s1640_s24, [#allocation5], %s1963_s17, %s1963_s17, %s1964_s18  }
0x148c   :  { %1960 = dma.done.wait [#allocation5], 256  }
0x148d   :  { %1961 = vsyncadd [#allocation5], 4294967040 }
0x148e   :  { %1650 = vsyncpa [#allocation4], 1 }
0x148f   :  { %1651 = vsyncpa [#allocation7], 1 }
0x1490   :  { %1652 = vsyncpa [#allocation10], 1 }
0x1491   :  { %1653 = vsyncpa [#allocation5], 1 }

</bundles_post_ra>
